<compile_context>
chip_gen: v7x
topology: tpu7x:2x2x1
jax: 0.10.0
libtpu: 0.0.40
codegen_flags: <defaults>
</compile_context>

<pallas_src>
import functools

import jax
import jax.numpy as jnp
from jax import lax
from jax.experimental import pallas as pl
from jax.experimental.pallas import tpu as pltpu


def _round_up(x, m):
    return (int(x) + m - 1) // m * m


def _gather_blend_kernel(idx_ref, w_ref, grid_ref, o_ref, *, tile_b, unroll):
    """Fused 4-tap gather + bilinear blend for one batch tile.

    idx_ref : SMEM (4, B_pad) int32   flat corner row indices (scalar prefetch)
    w_ref   : SMEM (4, B_pad) f32     bilinear corner weights
    grid_ref: VMEM (H*W, C)    f32    channels-last grid, resident across tiles
    o_ref   : VMEM (tile_b, C) f32    output tile
    """
    base = pl.program_id(0) * tile_b

    def body(b, carry):
        q = base + b
        row = (w_ref[0, q] * grid_ref[pl.ds(idx_ref[0, q], 1), :]
               + w_ref[1, q] * grid_ref[pl.ds(idx_ref[1, q], 1), :]
               + w_ref[2, q] * grid_ref[pl.ds(idx_ref[2, q], 1), :]
               + w_ref[3, q] * grid_ref[pl.ds(idx_ref[3, q], 1), :])
        o_ref[pl.ds(b, 1), :] = row.astype(o_ref.dtype)
        return carry

    # Unrolled loop (fully for small tiles) so the scheduler sees all the
    # independent dynamic row loads at once.
    lax.fori_loop(0, tile_b, body, 0, unroll=unroll)


def prepare_grid_field(grid):
    """One-time relayout of the GridField buffer (hoisted out of forward)."""
    grid = jnp.asarray(grid, dtype=jnp.float32)
    if grid.ndim == 2:                    # coords == 1 -> singleton height axis
        grid = grid[:, None, :]
    C, H, W = grid.shape
    grid_flat = jnp.transpose(grid, (1, 2, 0)).reshape(H * W, C)
    return grid_flat, (C, H, W)


def grid_field_forward(grid_flat, dims, X, bounds=1.0, padding_mode="border",
                       tile_b=None):
    """JAX/Pallas equivalent of GridField.forward.

    grid_flat, dims: output of prepare_grid_field(grid)
    X: (B, coords) query points in [-bounds, bounds]
    returns: (B, C)
    """
    if padding_mode != "border":
        # TODO(synk): implement 'zeros' / 'reflection' padding modes.
        raise NotImplementedError("Only padding_mode='border' is implemented.")

    C, H, W = dims
    HW = H * W
    B = X.shape[0]
    coords = X.shape[1]

    # --- O(B) coordinate math in the wrapper (keeps the kernel a pure
    # gather+blend).  align_corners=True un-normalization + 'border' clamp.
    Xn = jnp.asarray(X, dtype=jnp.float32)
    if bounds != 1.0:
        Xn = Xn / jnp.float32(bounds)
    gx = Xn[:, 0]
    gy = Xn[:, 1] if coords >= 2 else jnp.zeros_like(gx)

    ix = jnp.clip((gx + 1.0) * 0.5 * float(W - 1), 0.0, float(W - 1))
    iy = jnp.clip((gy + 1.0) * 0.5 * float(H - 1), 0.0, float(H - 1))
    ix0f = jnp.floor(ix)
    iy0f = jnp.floor(iy)
    fx = ix - ix0f
    fy = iy - iy0f
    ix0 = jnp.clip(ix0f.astype(jnp.int32), 0, W - 1)   # clip guards NaN queries
    iy0 = jnp.clip(iy0f.astype(jnp.int32), 0, H - 1)
    ix1 = jnp.minimum(ix0 + 1, W - 1)
    iy1 = jnp.minimum(iy0 + 1, H - 1)

    idx = jnp.stack([iy0 * W + ix0, iy0 * W + ix1,
                     iy1 * W + ix0, iy1 * W + ix1], axis=0).astype(jnp.int32)
    w = jnp.stack([(1.0 - fy) * (1.0 - fx), (1.0 - fy) * fx,
                   fy * (1.0 - fx), fy * fx], axis=0).astype(jnp.float32)

    # --- Tile the batch (parallel grid axis).  Adaptive tile size: one grid
    # step for small batches, 128-row tiles for large ones.
    if tile_b is None:
        tile_b = min(_round_up(max(B, 1), 8), 128)
    else:
        tile_b = max(8, _round_up(tile_b, 8))
    n_tiles = pl.cdiv(B, tile_b)
    B_pad = n_tiles * tile_b
    if B_pad != B:
        idx = jnp.pad(idx, ((0, 0), (0, B_pad - B)))     # padded rows: index 0
        w = jnp.pad(w, ((0, 0), (0, B_pad - B)))         # padded rows: weight 0

    unroll = True if tile_b <= 32 else 8
    kernel = functools.partial(_gather_blend_kernel, tile_b=tile_b,
                               unroll=unroll)

    # TODO(synk): for grids too large for VMEM, switch grid_flat to an
    # HBM-resident input (memory_space=pl.ANY) with a manual make_async_copy
    # row gather (double-buffered); likewise chunk idx/w for very large B so
    # they fit SMEM.
    out = pl.pallas_call(
        kernel,
        out_shape=jax.ShapeDtypeStruct((B_pad, C), jnp.float32),
        grid_spec=pltpu.PrefetchScalarGridSpec(
            num_scalar_prefetch=1,                         # idx -> SMEM
            grid=(n_tiles,),
            in_specs=[
                pl.BlockSpec(memory_space=pltpu.MemorySpace.SMEM),   # weights
                pl.BlockSpec((HW, C), lambda i, idx_ref: (0, 0)),    # resident
            ],
            out_specs=pl.BlockSpec((tile_b, C), lambda i, idx_ref: (i, 0)),
        ),
        compiler_params=pltpu.CompilerParams(
            dimension_semantics=("parallel",)),
    )(idx, w, grid_flat)

    return out[:B]


def _reference_forward(grid, X, bounds=1.0):
    """Pure-JAX reference of F.grid_sample(align_corners=True, 'border')."""
    C, H, W = grid.shape
    Xn = X / bounds
    ix = jnp.clip((Xn[:, 0] + 1.0) * 0.5 * (W - 1), 0.0, W - 1)
    iy = jnp.clip((Xn[:, 1] + 1.0) * 0.5 * (H - 1), 0.0, H - 1)
    ix0 = jnp.floor(ix).astype(jnp.int32)
    iy0 = jnp.floor(iy).astype(jnp.int32)
    ix1 = jnp.minimum(ix0 + 1, W - 1)
    iy1 = jnp.minimum(iy0 + 1, H - 1)
    fx = ix - ix0
    fy = iy - iy0
    v00 = grid[:, iy0, ix0]
    v01 = grid[:, iy0, ix1]
    v10 = grid[:, iy1, ix0]
    v11 = grid[:, iy1, ix1]
    out = (v00 * (1 - fy) * (1 - fx) + v01 * (1 - fy) * fx
           + v10 * fy * (1 - fx) + v11 * fy * fx)
    return out.T


if __name__ == "__main__":
    key = jax.random.PRNGKey(0)
    k_grid, k_x = jax.random.split(key)

    C, H, W = 4, 16, 16                      # GridField buffer: (channels, *dims)
    B = 13                                   # batch of query points (coords = 2)

    grid_buf = jax.random.normal(k_grid, (C, H, W), dtype=jnp.float32)
    # Queries slightly outside [-1, 1] to exercise the 'border' clamp.
    X = jax.random.uniform(k_x, (B, 2), minval=-1.2, maxval=1.2,
                           dtype=jnp.float32)

    grid_flat, dims = prepare_grid_field(grid_buf)   # one-time relayout
    out = grid_field_forward(grid_flat, dims, X, bounds=1.0,
                             padding_mode="border")
    out = jax.block_until_ready(out)

    ref = _reference_forward(grid_buf, X, bounds=1.0)
    assert out.shape == (B, C)
    assert jnp.allclose(out, ref, atol=1e-5), (out, ref)

    print("KERNEL_OK")
</pallas_src>

<mosaic_0001>
module attributes {stable_mosaic.version = 11 : i64} {
  func.func @_gather_blend_kernel(%arg0: i32, %arg1: memref<4x16xi32, #tpu.memory_space<smem>>, %arg2: memref<4x16xf32, #tpu.memory_space<smem>>, %arg3: memref<256x4xf32, #tpu.memory_space<vmem>>, %arg4: memref<16x4xf32, #tpu.memory_space<vmem>>) attributes {dimension_semantics = [#tpu.dimension_semantics<parallel>], iteration_bounds = array<i64: 1>, scalar_prefetch = 1 : i64, scratch_operands = 0 : i64, tpu.core_type = #tpu.core_type<tc>, window_params = [{transform_indices = @transform_0, window_bounds = array<i64: 4, 16>}, {pipeline_mode = #tpu.pipeline_mode<synchronous>, transform_indices = @transform_1, window_bounds = array<i64: 256, 4>}, {transform_indices = @transform_2, window_bounds = array<i64: 16, 4>}]} {
    %c16_i32 = arith.constant 16 : i32
    %0 = arith.muli %arg0, %c16_i32 : i32
    %c0_i32 = arith.constant 0 : i32
    %1 = arith.addi %0, %c0_i32 : i32
    %c0 = arith.constant 0 : index
    %2 = arith.index_cast %1 : i32 to index
    %3 = memref.load %arg2[%c0, %2] : memref<4x16xf32, #tpu.memory_space<smem>>
    %c0_0 = arith.constant 0 : index
    %4 = arith.index_cast %1 : i32 to index
    %5 = memref.load %arg1[%c0_0, %4] : memref<4x16xi32, #tpu.memory_space<smem>>
    %6 = arith.index_cast %5 : i32 to index
    %c0_1 = arith.constant 0 : index
    %7 = vector.load %arg3[%6, %c0_1] : memref<256x4xf32, #tpu.memory_space<vmem>>, vector<1x4xf32>
    %8 = vector.broadcast %3 : f32 to vector<1x4xf32>
    %9 = arith.mulf %8, %7 : vector<1x4xf32>
    %c1 = arith.constant 1 : index
    %10 = arith.index_cast %1 : i32 to index
    %11 = memref.load %arg2[%c1, %10] : memref<4x16xf32, #tpu.memory_space<smem>>
    %c1_2 = arith.constant 1 : index
    %12 = arith.index_cast %1 : i32 to index
    %13 = memref.load %arg1[%c1_2, %12] : memref<4x16xi32, #tpu.memory_space<smem>>
    %14 = arith.index_cast %13 : i32 to index
    %c0_3 = arith.constant 0 : index
    %15 = vector.load %arg3[%14, %c0_3] : memref<256x4xf32, #tpu.memory_space<vmem>>, vector<1x4xf32>
    %16 = vector.broadcast %11 : f32 to vector<1x4xf32>
    %17 = arith.mulf %16, %15 : vector<1x4xf32>
    %18 = arith.addf %9, %17 : vector<1x4xf32>
    %c2 = arith.constant 2 : index
    %19 = arith.index_cast %1 : i32 to index
    %20 = memref.load %arg2[%c2, %19] : memref<4x16xf32, #tpu.memory_space<smem>>
    %c2_4 = arith.constant 2 : index
    %21 = arith.index_cast %1 : i32 to index
    %22 = memref.load %arg1[%c2_4, %21] : memref<4x16xi32, #tpu.memory_space<smem>>
    %23 = arith.index_cast %22 : i32 to index
    %c0_5 = arith.constant 0 : index
    %24 = vector.load %arg3[%23, %c0_5] : memref<256x4xf32, #tpu.memory_space<vmem>>, vector<1x4xf32>
    %25 = vector.broadcast %20 : f32 to vector<1x4xf32>
    %26 = arith.mulf %25, %24 : vector<1x4xf32>
    %27 = arith.addf %18, %26 : vector<1x4xf32>
    %c3 = arith.constant 3 : index
    %28 = arith.index_cast %1 : i32 to index
    %29 = memref.load %arg2[%c3, %28] : memref<4x16xf32, #tpu.memory_space<smem>>
    %c3_6 = arith.constant 3 : index
    %30 = arith.index_cast %1 : i32 to index
    %31 = memref.load %arg1[%c3_6, %30] : memref<4x16xi32, #tpu.memory_space<smem>>
    %32 = arith.index_cast %31 : i32 to index
    %c0_7 = arith.constant 0 : index
    %33 = vector.load %arg3[%32, %c0_7] : memref<256x4xf32, #tpu.memory_space<vmem>>, vector<1x4xf32>
    %34 = vector.broadcast %29 : f32 to vector<1x4xf32>
    %35 = arith.mulf %34, %33 : vector<1x4xf32>
    %36 = arith.addf %27, %35 : vector<1x4xf32>
    %37 = arith.index_cast %c0_i32 : i32 to index
    %c0_8 = arith.constant 0 : index
    %38 = vector.load %arg4[%37, %c0_8] : memref<16x4xf32, #tpu.memory_space<vmem>>, vector<1x4xf32>
    tpu.vector_store %arg4[%37, %c0_8], %36 {strides = array<i32>} : memref<16x4xf32, #tpu.memory_space<vmem>>, vector<1x4xf32>,
    %c1_i32 = arith.constant 1 : i32
    %39 = arith.addi %0, %c1_i32 : i32
    %c0_9 = arith.constant 0 : index
    %40 = arith.index_cast %39 : i32 to index
    %41 = memref.load %arg2[%c0_9, %40] : memref<4x16xf32, #tpu.memory_space<smem>>
    %c0_10 = arith.constant 0 : index
    %42 = arith.index_cast %39 : i32 to index
    %43 = memref.load %arg1[%c0_10, %42] : memref<4x16xi32, #tpu.memory_space<smem>>
    %44 = arith.index_cast %43 : i32 to index
    %c0_11 = arith.constant 0 : index
    %45 = vector.load %arg3[%44, %c0_11] : memref<256x4xf32, #tpu.memory_space<vmem>>, vector<1x4xf32>
    %46 = vector.broadcast %41 : f32 to vector<1x4xf32>
    %47 = arith.mulf %46, %45 : vector<1x4xf32>
    %c1_12 = arith.constant 1 : index
    %48 = arith.index_cast %39 : i32 to index
    %49 = memref.load %arg2[%c1_12, %48] : memref<4x16xf32, #tpu.memory_space<smem>>
    %c1_13 = arith.constant 1 : index
    %50 = arith.index_cast %39 : i32 to index
    %51 = memref.load %arg1[%c1_13, %50] : memref<4x16xi32, #tpu.memory_space<smem>>
    %52 = arith.index_cast %51 : i32 to index
    %c0_14 = arith.constant 0 : index
    %53 = vector.load %arg3[%52, %c0_14] : memref<256x4xf32, #tpu.memory_space<vmem>>, vector<1x4xf32>
    %54 = vector.broadcast %49 : f32 to vector<1x4xf32>
    %55 = arith.mulf %54, %53 : vector<1x4xf32>
    %56 = arith.addf %47, %55 : vector<1x4xf32>
    %c2_15 = arith.constant 2 : index
    %57 = arith.index_cast %39 : i32 to index
    %58 = memref.load %arg2[%c2_15, %57] : memref<4x16xf32, #tpu.memory_space<smem>>
    %c2_16 = arith.constant 2 : index
    %59 = arith.index_cast %39 : i32 to index
    %60 = memref.load %arg1[%c2_16, %59] : memref<4x16xi32, #tpu.memory_space<smem>>
    %61 = arith.index_cast %60 : i32 to index
    %c0_17 = arith.constant 0 : index
    %62 = vector.load %arg3[%61, %c0_17] : memref<256x4xf32, #tpu.memory_space<vmem>>, vector<1x4xf32>
    %63 = vector.broadcast %58 : f32 to vector<1x4xf32>
    %64 = arith.mulf %63, %62 : vector<1x4xf32>
    %65 = arith.addf %56, %64 : vector<1x4xf32>
    %c3_18 = arith.constant 3 : index
    %66 = arith.index_cast %39 : i32 to index
    %67 = memref.load %arg2[%c3_18, %66] : memref<4x16xf32, #tpu.memory_space<smem>>
    %c3_19 = arith.constant 3 : index
    %68 = arith.index_cast %39 : i32 to index
    %69 = memref.load %arg1[%c3_19, %68] : memref<4x16xi32, #tpu.memory_space<smem>>
    %70 = arith.index_cast %69 : i32 to index
    %c0_20 = arith.constant 0 : index
    %71 = vector.load %arg3[%70, %c0_20] : memref<256x4xf32, #tpu.memory_space<vmem>>, vector<1x4xf32>
    %72 = vector.broadcast %67 : f32 to vector<1x4xf32>
    %73 = arith.mulf %72, %71 : vector<1x4xf32>
    %74 = arith.addf %65, %73 : vector<1x4xf32>
    %75 = arith.index_cast %c1_i32 : i32 to index
    %c0_21 = arith.constant 0 : index
    %76 = vector.load %arg4[%75, %c0_21] : memref<16x4xf32, #tpu.memory_space<vmem>>, vector<1x4xf32>
    tpu.vector_store %arg4[%75, %c0_21], %74 {strides = array<i32>} : memref<16x4xf32, #tpu.memory_space<vmem>>, vector<1x4xf32>,
    %c2_i32 = arith.constant 2 : i32
    %77 = arith.addi %0, %c2_i32 : i32
    %c0_22 = arith.constant 0 : index
    %78 = arith.index_cast %77 : i32 to index
    %79 = memref.load %arg2[%c0_22, %78] : memref<4x16xf32, #tpu.memory_space<smem>>
    %c0_23 = arith.constant 0 : index
    %80 = arith.index_cast %77 : i32 to index
    %81 = memref.load %arg1[%c0_23, %80] : memref<4x16xi32, #tpu.memory_space<smem>>
    %82 = arith.index_cast %81 : i32 to index
    %c0_24 = arith.constant 0 : index
    %83 = vector.load %arg3[%82, %c0_24] : memref<256x4xf32, #tpu.memory_space<vmem>>, vector<1x4xf32>
    %84 = vector.broadcast %79 : f32 to vector<1x4xf32>
    %85 = arith.mulf %84, %83 : vector<1x4xf32>
    %c1_25 = arith.constant 1 : index
    %86 = arith.index_cast %77 : i32 to index
    %87 = memref.load %arg2[%c1_25, %86] : memref<4x16xf32, #tpu.memory_space<smem>>
    %c1_26 = arith.constant 1 : index
    %88 = arith.index_cast %77 : i32 to index
    %89 = memref.load %arg1[%c1_26, %88] : memref<4x16xi32, #tpu.memory_space<smem>>
    %90 = arith.index_cast %89 : i32 to index
    %c0_27 = arith.constant 0 : index
    %91 = vector.load %arg3[%90, %c0_27] : memref<256x4xf32, #tpu.memory_space<vmem>>, vector<1x4xf32>
    %92 = vector.broadcast %87 : f32 to vector<1x4xf32>
    %93 = arith.mulf %92, %91 : vector<1x4xf32>
    %94 = arith.addf %85, %93 : vector<1x4xf32>
    %c2_28 = arith.constant 2 : index
    %95 = arith.index_cast %77 : i32 to index
    %96 = memref.load %arg2[%c2_28, %95] : memref<4x16xf32, #tpu.memory_space<smem>>
    %c2_29 = arith.constant 2 : index
    %97 = arith.index_cast %77 : i32 to index
    %98 = memref.load %arg1[%c2_29, %97] : memref<4x16xi32, #tpu.memory_space<smem>>
    %99 = arith.index_cast %98 : i32 to index
    %c0_30 = arith.constant 0 : index
    %100 = vector.load %arg3[%99, %c0_30] : memref<256x4xf32, #tpu.memory_space<vmem>>, vector<1x4xf32>
    %101 = vector.broadcast %96 : f32 to vector<1x4xf32>
    %102 = arith.mulf %101, %100 : vector<1x4xf32>
    %103 = arith.addf %94, %102 : vector<1x4xf32>
    %c3_31 = arith.constant 3 : index
    %104 = arith.index_cast %77 : i32 to index
    %105 = memref.load %arg2[%c3_31, %104] : memref<4x16xf32, #tpu.memory_space<smem>>
    %c3_32 = arith.constant 3 : index
    %106 = arith.index_cast %77 : i32 to index
    %107 = memref.load %arg1[%c3_32, %106] : memref<4x16xi32, #tpu.memory_space<smem>>
    %108 = arith.index_cast %107 : i32 to index
    %c0_33 = arith.constant 0 : index
    %109 = vector.load %arg3[%108, %c0_33] : memref<256x4xf32, #tpu.memory_space<vmem>>, vector<1x4xf32>
    %110 = vector.broadcast %105 : f32 to vector<1x4xf32>
    %111 = arith.mulf %110, %109 : vector<1x4xf32>
    %112 = arith.addf %103, %111 : vector<1x4xf32>
    %113 = arith.index_cast %c2_i32 : i32 to index
    %c0_34 = arith.constant 0 : index
    %114 = vector.load %arg4[%113, %c0_34] : memref<16x4xf32, #tpu.memory_space<vmem>>, vector<1x4xf32>
    tpu.vector_store %arg4[%113, %c0_34], %112 {strides = array<i32>} : memref<16x4xf32, #tpu.memory_space<vmem>>, vector<1x4xf32>,
    %c3_i32 = arith.constant 3 : i32
    %115 = arith.addi %0, %c3_i32 : i32
    %c0_35 = arith.constant 0 : index
    %116 = arith.index_cast %115 : i32 to index
    %117 = memref.load %arg2[%c0_35, %116] : memref<4x16xf32, #tpu.memory_space<smem>>
    %c0_36 = arith.constant 0 : index
    %118 = arith.index_cast %115 : i32 to index
    %119 = memref.load %arg1[%c0_36, %118] : memref<4x16xi32, #tpu.memory_space<smem>>
    %120 = arith.index_cast %119 : i32 to index
    %c0_37 = arith.constant 0 : index
    %121 = vector.load %arg3[%120, %c0_37] : memref<256x4xf32, #tpu.memory_space<vmem>>, vector<1x4xf32>
    %122 = vector.broadcast %117 : f32 to vector<1x4xf32>
    %123 = arith.mulf %122, %121 : vector<1x4xf32>
    %c1_38 = arith.constant 1 : index
    %124 = arith.index_cast %115 : i32 to index
    %125 = memref.load %arg2[%c1_38, %124] : memref<4x16xf32, #tpu.memory_space<smem>>
    %c1_39 = arith.constant 1 : index
    %126 = arith.index_cast %115 : i32 to index
    %127 = memref.load %arg1[%c1_39, %126] : memref<4x16xi32, #tpu.memory_space<smem>>
    %128 = arith.index_cast %127 : i32 to index
    %c0_40 = arith.constant 0 : index
    %129 = vector.load %arg3[%128, %c0_40] : memref<256x4xf32, #tpu.memory_space<vmem>>, vector<1x4xf32>
    %130 = vector.broadcast %125 : f32 to vector<1x4xf32>
    %131 = arith.mulf %130, %129 : vector<1x4xf32>
    %132 = arith.addf %123, %131 : vector<1x4xf32>
    %c2_41 = arith.constant 2 : index
    %133 = arith.index_cast %115 : i32 to index
    %134 = memref.load %arg2[%c2_41, %133] : memref<4x16xf32, #tpu.memory_space<smem>>
    %c2_42 = arith.constant 2 : index
    %135 = arith.index_cast %115 : i32 to index
    %136 = memref.load %arg1[%c2_42, %135] : memref<4x16xi32, #tpu.memory_space<smem>>
    %137 = arith.index_cast %136 : i32 to index
    %c0_43 = arith.constant 0 : index
    %138 = vector.load %arg3[%137, %c0_43] : memref<256x4xf32, #tpu.memory_space<vmem>>, vector<1x4xf32>
    %139 = vector.broadcast %134 : f32 to vector<1x4xf32>
    %140 = arith.mulf %139, %138 : vector<1x4xf32>
    %141 = arith.addf %132, %140 : vector<1x4xf32>
    %c3_44 = arith.constant 3 : index
    %142 = arith.index_cast %115 : i32 to index
    %143 = memref.load %arg2[%c3_44, %142] : memref<4x16xf32, #tpu.memory_space<smem>>
    %c3_45 = arith.constant 3 : index
    %144 = arith.index_cast %115 : i32 to index
    %145 = memref.load %arg1[%c3_45, %144] : memref<4x16xi32, #tpu.memory_space<smem>>
    %146 = arith.index_cast %145 : i32 to index
    %c0_46 = arith.constant 0 : index
    %147 = vector.load %arg3[%146, %c0_46] : memref<256x4xf32, #tpu.memory_space<vmem>>, vector<1x4xf32>
    %148 = vector.broadcast %143 : f32 to vector<1x4xf32>
    %149 = arith.mulf %148, %147 : vector<1x4xf32>
    %150 = arith.addf %141, %149 : vector<1x4xf32>
    %151 = arith.index_cast %c3_i32 : i32 to index
    %c0_47 = arith.constant 0 : index
    %152 = vector.load %arg4[%151, %c0_47] : memref<16x4xf32, #tpu.memory_space<vmem>>, vector<1x4xf32>
    tpu.vector_store %arg4[%151, %c0_47], %150 {strides = array<i32>} : memref<16x4xf32, #tpu.memory_space<vmem>>, vector<1x4xf32>,
    %c4_i32 = arith.constant 4 : i32
    %153 = arith.addi %0, %c4_i32 : i32
    %c0_48 = arith.constant 0 : index
    %154 = arith.index_cast %153 : i32 to index
    %155 = memref.load %arg2[%c0_48, %154] : memref<4x16xf32, #tpu.memory_space<smem>>
    %c0_49 = arith.constant 0 : index
    %156 = arith.index_cast %153 : i32 to index
    %157 = memref.load %arg1[%c0_49, %156] : memref<4x16xi32, #tpu.memory_space<smem>>
    %158 = arith.index_cast %157 : i32 to index
    %c0_50 = arith.constant 0 : index
    %159 = vector.load %arg3[%158, %c0_50] : memref<256x4xf32, #tpu.memory_space<vmem>>, vector<1x4xf32>
    %160 = vector.broadcast %155 : f32 to vector<1x4xf32>
    %161 = arith.mulf %160, %159 : vector<1x4xf32>
    %c1_51 = arith.constant 1 : index
    %162 = arith.index_cast %153 : i32 to index
    %163 = memref.load %arg2[%c1_51, %162] : memref<4x16xf32, #tpu.memory_space<smem>>
    %c1_52 = arith.constant 1 : index
    %164 = arith.index_cast %153 : i32 to index
    %165 = memref.load %arg1[%c1_52, %164] : memref<4x16xi32, #tpu.memory_space<smem>>
    %166 = arith.index_cast %165 : i32 to index
    %c0_53 = arith.constant 0 : index
    %167 = vector.load %arg3[%166, %c0_53] : memref<256x4xf32, #tpu.memory_space<vmem>>, vector<1x4xf32>
    %168 = vector.broadcast %163 : f32 to vector<1x4xf32>
    %169 = arith.mulf %168, %167 : vector<1x4xf32>
    %170 = arith.addf %161, %169 : vector<1x4xf32>
    %c2_54 = arith.constant 2 : index
    %171 = arith.index_cast %153 : i32 to index
    %172 = memref.load %arg2[%c2_54, %171] : memref<4x16xf32, #tpu.memory_space<smem>>
    %c2_55 = arith.constant 2 : index
    %173 = arith.index_cast %153 : i32 to index
    %174 = memref.load %arg1[%c2_55, %173] : memref<4x16xi32, #tpu.memory_space<smem>>
    %175 = arith.index_cast %174 : i32 to index
    %c0_56 = arith.constant 0 : index
    %176 = vector.load %arg3[%175, %c0_56] : memref<256x4xf32, #tpu.memory_space<vmem>>, vector<1x4xf32>
    %177 = vector.broadcast %172 : f32 to vector<1x4xf32>
    %178 = arith.mulf %177, %176 : vector<1x4xf32>
    %179 = arith.addf %170, %178 : vector<1x4xf32>
    %c3_57 = arith.constant 3 : index
    %180 = arith.index_cast %153 : i32 to index
    %181 = memref.load %arg2[%c3_57, %180] : memref<4x16xf32, #tpu.memory_space<smem>>
    %c3_58 = arith.constant 3 : index
    %182 = arith.index_cast %153 : i32 to index
    %183 = memref.load %arg1[%c3_58, %182] : memref<4x16xi32, #tpu.memory_space<smem>>
    %184 = arith.index_cast %183 : i32 to index
    %c0_59 = arith.constant 0 : index
    %185 = vector.load %arg3[%184, %c0_59] : memref<256x4xf32, #tpu.memory_space<vmem>>, vector<1x4xf32>
    %186 = vector.broadcast %181 : f32 to vector<1x4xf32>
    %187 = arith.mulf %186, %185 : vector<1x4xf32>
    %188 = arith.addf %179, %187 : vector<1x4xf32>
    %189 = arith.index_cast %c4_i32 : i32 to index
    %c0_60 = arith.constant 0 : index
    %190 = vector.load %arg4[%189, %c0_60] : memref<16x4xf32, #tpu.memory_space<vmem>>, vector<1x4xf32>
    tpu.vector_store %arg4[%189, %c0_60], %188 {strides = array<i32>} : memref<16x4xf32, #tpu.memory_space<vmem>>, vector<1x4xf32>,
    %c5_i32 = arith.constant 5 : i32
    %191 = arith.addi %0, %c5_i32 : i32
    %c0_61 = arith.constant 0 : index
    %192 = arith.index_cast %191 : i32 to index
    %193 = memref.load %arg2[%c0_61, %192] : memref<4x16xf32, #tpu.memory_space<smem>>
    %c0_62 = arith.constant 0 : index
    %194 = arith.index_cast %191 : i32 to index
    %195 = memref.load %arg1[%c0_62, %194] : memref<4x16xi32, #tpu.memory_space<smem>>
    %196 = arith.index_cast %195 : i32 to index
    %c0_63 = arith.constant 0 : index
    %197 = vector.load %arg3[%196, %c0_63] : memref<256x4xf32, #tpu.memory_space<vmem>>, vector<1x4xf32>
    %198 = vector.broadcast %193 : f32 to vector<1x4xf32>
    %199 = arith.mulf %198, %197 : vector<1x4xf32>
    %c1_64 = arith.constant 1 : index
    %200 = arith.index_cast %191 : i32 to index
    %201 = memref.load %arg2[%c1_64, %200] : memref<4x16xf32, #tpu.memory_space<smem>>
    %c1_65 = arith.constant 1 : index
    %202 = arith.index_cast %191 : i32 to index
    %203 = memref.load %arg1[%c1_65, %202] : memref<4x16xi32, #tpu.memory_space<smem>>
    %204 = arith.index_cast %203 : i32 to index
    %c0_66 = arith.constant 0 : index
    %205 = vector.load %arg3[%204, %c0_66] : memref<256x4xf32, #tpu.memory_space<vmem>>, vector<1x4xf32>
    %206 = vector.broadcast %201 : f32 to vector<1x4xf32>
    %207 = arith.mulf %206, %205 : vector<1x4xf32>
    %208 = arith.addf %199, %207 : vector<1x4xf32>
    %c2_67 = arith.constant 2 : index
    %209 = arith.index_cast %191 : i32 to index
    %210 = memref.load %arg2[%c2_67, %209] : memref<4x16xf32, #tpu.memory_space<smem>>
    %c2_68 = arith.constant 2 : index
    %211 = arith.index_cast %191 : i32 to index
    %212 = memref.load %arg1[%c2_68, %211] : memref<4x16xi32, #tpu.memory_space<smem>>
    %213 = arith.index_cast %212 : i32 to index
    %c0_69 = arith.constant 0 : index
    %214 = vector.load %arg3[%213, %c0_69] : memref<256x4xf32, #tpu.memory_space<vmem>>, vector<1x4xf32>
    %215 = vector.broadcast %210 : f32 to vector<1x4xf32>
    %216 = arith.mulf %215, %214 : vector<1x4xf32>
    %217 = arith.addf %208, %216 : vector<1x4xf32>
    %c3_70 = arith.constant 3 : index
    %218 = arith.index_cast %191 : i32 to index
    %219 = memref.load %arg2[%c3_70, %218] : memref<4x16xf32, #tpu.memory_space<smem>>
    %c3_71 = arith.constant 3 : index
    %220 = arith.index_cast %191 : i32 to index
    %221 = memref.load %arg1[%c3_71, %220] : memref<4x16xi32, #tpu.memory_space<smem>>
    %222 = arith.index_cast %221 : i32 to index
    %c0_72 = arith.constant 0 : index
    %223 = vector.load %arg3[%222, %c0_72] : memref<256x4xf32, #tpu.memory_space<vmem>>, vector<1x4xf32>
    %224 = vector.broadcast %219 : f32 to vector<1x4xf32>
    %225 = arith.mulf %224, %223 : vector<1x4xf32>
    %226 = arith.addf %217, %225 : vector<1x4xf32>
    %227 = arith.index_cast %c5_i32 : i32 to index
    %c0_73 = arith.constant 0 : index
    %228 = vector.load %arg4[%227, %c0_73] : memref<16x4xf32, #tpu.memory_space<vmem>>, vector<1x4xf32>
    tpu.vector_store %arg4[%227, %c0_73], %226 {strides = array<i32>} : memref<16x4xf32, #tpu.memory_space<vmem>>, vector<1x4xf32>,
    %c6_i32 = arith.constant 6 : i32
    %229 = arith.addi %0, %c6_i32 : i32
    %c0_74 = arith.constant 0 : index
    %230 = arith.index_cast %229 : i32 to index
    %231 = memref.load %arg2[%c0_74, %230] : memref<4x16xf32, #tpu.memory_space<smem>>
    %c0_75 = arith.constant 0 : index
    %232 = arith.index_cast %229 : i32 to index
    %233 = memref.load %arg1[%c0_75, %232] : memref<4x16xi32, #tpu.memory_space<smem>>
    %234 = arith.index_cast %233 : i32 to index
    %c0_76 = arith.constant 0 : index
    %235 = vector.load %arg3[%234, %c0_76] : memref<256x4xf32, #tpu.memory_space<vmem>>, vector<1x4xf32>
    %236 = vector.broadcast %231 : f32 to vector<1x4xf32>
    %237 = arith.mulf %236, %235 : vector<1x4xf32>
    %c1_77 = arith.constant 1 : index
    %238 = arith.index_cast %229 : i32 to index
    %239 = memref.load %arg2[%c1_77, %238] : memref<4x16xf32, #tpu.memory_space<smem>>
    %c1_78 = arith.constant 1 : index
    %240 = arith.index_cast %229 : i32 to index
    %241 = memref.load %arg1[%c1_78, %240] : memref<4x16xi32, #tpu.memory_space<smem>>
    %242 = arith.index_cast %241 : i32 to index
    %c0_79 = arith.constant 0 : index
    %243 = vector.load %arg3[%242, %c0_79] : memref<256x4xf32, #tpu.memory_space<vmem>>, vector<1x4xf32>
    %244 = vector.broadcast %239 : f32 to vector<1x4xf32>
    %245 = arith.mulf %244, %243 : vector<1x4xf32>
    %246 = arith.addf %237, %245 : vector<1x4xf32>
    %c2_80 = arith.constant 2 : index
    %247 = arith.index_cast %229 : i32 to index
    %248 = memref.load %arg2[%c2_80, %247] : memref<4x16xf32, #tpu.memory_space<smem>>
    %c2_81 = arith.constant 2 : index
    %249 = arith.index_cast %229 : i32 to index
    %250 = memref.load %arg1[%c2_81, %249] : memref<4x16xi32, #tpu.memory_space<smem>>
    %251 = arith.index_cast %250 : i32 to index
    %c0_82 = arith.constant 0 : index
    %252 = vector.load %arg3[%251, %c0_82] : memref<256x4xf32, #tpu.memory_space<vmem>>, vector<1x4xf32>
    %253 = vector.broadcast %248 : f32 to vector<1x4xf32>
    %254 = arith.mulf %253, %252 : vector<1x4xf32>
    %255 = arith.addf %246, %254 : vector<1x4xf32>
    %c3_83 = arith.constant 3 : index
    %256 = arith.index_cast %229 : i32 to index
    %257 = memref.load %arg2[%c3_83, %256] : memref<4x16xf32, #tpu.memory_space<smem>>
    %c3_84 = arith.constant 3 : index
    %258 = arith.index_cast %229 : i32 to index
    %259 = memref.load %arg1[%c3_84, %258] : memref<4x16xi32, #tpu.memory_space<smem>>
    %260 = arith.index_cast %259 : i32 to index
    %c0_85 = arith.constant 0 : index
    %261 = vector.load %arg3[%260, %c0_85] : memref<256x4xf32, #tpu.memory_space<vmem>>, vector<1x4xf32>
    %262 = vector.broadcast %257 : f32 to vector<1x4xf32>
    %263 = arith.mulf %262, %261 : vector<1x4xf32>
    %264 = arith.addf %255, %263 : vector<1x4xf32>
    %265 = arith.index_cast %c6_i32 : i32 to index
    %c0_86 = arith.constant 0 : index
    %266 = vector.load %arg4[%265, %c0_86] : memref<16x4xf32, #tpu.memory_space<vmem>>, vector<1x4xf32>
    tpu.vector_store %arg4[%265, %c0_86], %264 {strides = array<i32>} : memref<16x4xf32, #tpu.memory_space<vmem>>, vector<1x4xf32>,
    %c7_i32 = arith.constant 7 : i32
    %267 = arith.addi %0, %c7_i32 : i32
    %c0_87 = arith.constant 0 : index
    %268 = arith.index_cast %267 : i32 to index
    %269 = memref.load %arg2[%c0_87, %268] : memref<4x16xf32, #tpu.memory_space<smem>>
    %c0_88 = arith.constant 0 : index
    %270 = arith.index_cast %267 : i32 to index
    %271 = memref.load %arg1[%c0_88, %270] : memref<4x16xi32, #tpu.memory_space<smem>>
    %272 = arith.index_cast %271 : i32 to index
    %c0_89 = arith.constant 0 : index
    %273 = vector.load %arg3[%272, %c0_89] : memref<256x4xf32, #tpu.memory_space<vmem>>, vector<1x4xf32>
    %274 = vector.broadcast %269 : f32 to vector<1x4xf32>
    %275 = arith.mulf %274, %273 : vector<1x4xf32>
    %c1_90 = arith.constant 1 : index
    %276 = arith.index_cast %267 : i32 to index
    %277 = memref.load %arg2[%c1_90, %276] : memref<4x16xf32, #tpu.memory_space<smem>>
    %c1_91 = arith.constant 1 : index
    %278 = arith.index_cast %267 : i32 to index
    %279 = memref.load %arg1[%c1_91, %278] : memref<4x16xi32, #tpu.memory_space<smem>>
    %280 = arith.index_cast %279 : i32 to index
    %c0_92 = arith.constant 0 : index
    %281 = vector.load %arg3[%280, %c0_92] : memref<256x4xf32, #tpu.memory_space<vmem>>, vector<1x4xf32>
    %282 = vector.broadcast %277 : f32 to vector<1x4xf32>
    %283 = arith.mulf %282, %281 : vector<1x4xf32>
    %284 = arith.addf %275, %283 : vector<1x4xf32>
    %c2_93 = arith.constant 2 : index
    %285 = arith.index_cast %267 : i32 to index
    %286 = memref.load %arg2[%c2_93, %285] : memref<4x16xf32, #tpu.memory_space<smem>>
    %c2_94 = arith.constant 2 : index
    %287 = arith.index_cast %267 : i32 to index
    %288 = memref.load %arg1[%c2_94, %287] : memref<4x16xi32, #tpu.memory_space<smem>>
    %289 = arith.index_cast %288 : i32 to index
    %c0_95 = arith.constant 0 : index
    %290 = vector.load %arg3[%289, %c0_95] : memref<256x4xf32, #tpu.memory_space<vmem>>, vector<1x4xf32>
    %291 = vector.broadcast %286 : f32 to vector<1x4xf32>
    %292 = arith.mulf %291, %290 : vector<1x4xf32>
    %293 = arith.addf %284, %292 : vector<1x4xf32>
    %c3_96 = arith.constant 3 : index
    %294 = arith.index_cast %267 : i32 to index
    %295 = memref.load %arg2[%c3_96, %294] : memref<4x16xf32, #tpu.memory_space<smem>>
    %c3_97 = arith.constant 3 : index
    %296 = arith.index_cast %267 : i32 to index
    %297 = memref.load %arg1[%c3_97, %296] : memref<4x16xi32, #tpu.memory_space<smem>>
    %298 = arith.index_cast %297 : i32 to index
    %c0_98 = arith.constant 0 : index
    %299 = vector.load %arg3[%298, %c0_98] : memref<256x4xf32, #tpu.memory_space<vmem>>, vector<1x4xf32>
    %300 = vector.broadcast %295 : f32 to vector<1x4xf32>
    %301 = arith.mulf %300, %299 : vector<1x4xf32>
    %302 = arith.addf %293, %301 : vector<1x4xf32>
    %303 = arith.index_cast %c7_i32 : i32 to index
    %c0_99 = arith.constant 0 : index
    %304 = vector.load %arg4[%303, %c0_99] : memref<16x4xf32, #tpu.memory_space<vmem>>, vector<1x4xf32>
    tpu.vector_store %arg4[%303, %c0_99], %302 {strides = array<i32>} : memref<16x4xf32, #tpu.memory_space<vmem>>, vector<1x4xf32>,
    %c8_i32 = arith.constant 8 : i32
    %305 = arith.addi %0, %c8_i32 : i32
    %c0_100 = arith.constant 0 : index
    %306 = arith.index_cast %305 : i32 to index
    %307 = memref.load %arg2[%c0_100, %306] : memref<4x16xf32, #tpu.memory_space<smem>>
    %c0_101 = arith.constant 0 : index
    %308 = arith.index_cast %305 : i32 to index
    %309 = memref.load %arg1[%c0_101, %308] : memref<4x16xi32, #tpu.memory_space<smem>>
    %310 = arith.index_cast %309 : i32 to index
    %c0_102 = arith.constant 0 : index
    %311 = vector.load %arg3[%310, %c0_102] : memref<256x4xf32, #tpu.memory_space<vmem>>, vector<1x4xf32>
    %312 = vector.broadcast %307 : f32 to vector<1x4xf32>
    %313 = arith.mulf %312, %311 : vector<1x4xf32>
    %c1_103 = arith.constant 1 : index
    %314 = arith.index_cast %305 : i32 to index
    %315 = memref.load %arg2[%c1_103, %314] : memref<4x16xf32, #tpu.memory_space<smem>>
    %c1_104 = arith.constant 1 : index
    %316 = arith.index_cast %305 : i32 to index
    %317 = memref.load %arg1[%c1_104, %316] : memref<4x16xi32, #tpu.memory_space<smem>>
    %318 = arith.index_cast %317 : i32 to index
    %c0_105 = arith.constant 0 : index
    %319 = vector.load %arg3[%318, %c0_105] : memref<256x4xf32, #tpu.memory_space<vmem>>, vector<1x4xf32>
    %320 = vector.broadcast %315 : f32 to vector<1x4xf32>
    %321 = arith.mulf %320, %319 : vector<1x4xf32>
    %322 = arith.addf %313, %321 : vector<1x4xf32>
    %c2_106 = arith.constant 2 : index
    %323 = arith.index_cast %305 : i32 to index
    %324 = memref.load %arg2[%c2_106, %323] : memref<4x16xf32, #tpu.memory_space<smem>>
    %c2_107 = arith.constant 2 : index
    %325 = arith.index_cast %305 : i32 to index
    %326 = memref.load %arg1[%c2_107, %325] : memref<4x16xi32, #tpu.memory_space<smem>>
    %327 = arith.index_cast %326 : i32 to index
    %c0_108 = arith.constant 0 : index
    %328 = vector.load %arg3[%327, %c0_108] : memref<256x4xf32, #tpu.memory_space<vmem>>, vector<1x4xf32>
    %329 = vector.broadcast %324 : f32 to vector<1x4xf32>
    %330 = arith.mulf %329, %328 : vector<1x4xf32>
    %331 = arith.addf %322, %330 : vector<1x4xf32>
    %c3_109 = arith.constant 3 : index
    %332 = arith.index_cast %305 : i32 to index
    %333 = memref.load %arg2[%c3_109, %332] : memref<4x16xf32, #tpu.memory_space<smem>>
    %c3_110 = arith.constant 3 : index
    %334 = arith.index_cast %305 : i32 to index
    %335 = memref.load %arg1[%c3_110, %334] : memref<4x16xi32, #tpu.memory_space<smem>>
    %336 = arith.index_cast %335 : i32 to index
    %c0_111 = arith.constant 0 : index
    %337 = vector.load %arg3[%336, %c0_111] : memref<256x4xf32, #tpu.memory_space<vmem>>, vector<1x4xf32>
    %338 = vector.broadcast %333 : f32 to vector<1x4xf32>
    %339 = arith.mulf %338, %337 : vector<1x4xf32>
    %340 = arith.addf %331, %339 : vector<1x4xf32>
    %341 = arith.index_cast %c8_i32 : i32 to index
    %c0_112 = arith.constant 0 : index
    %342 = vector.load %arg4[%341, %c0_112] : memref<16x4xf32, #tpu.memory_space<vmem>>, vector<1x4xf32>
    tpu.vector_store %arg4[%341, %c0_112], %340 {strides = array<i32>} : memref<16x4xf32, #tpu.memory_space<vmem>>, vector<1x4xf32>,
    %c9_i32 = arith.constant 9 : i32
    %343 = arith.addi %0, %c9_i32 : i32
    %c0_113 = arith.constant 0 : index
    %344 = arith.index_cast %343 : i32 to index
    %345 = memref.load %arg2[%c0_113, %344] : memref<4x16xf32, #tpu.memory_space<smem>>
    %c0_114 = arith.constant 0 : index
    %346 = arith.index_cast %343 : i32 to index
    %347 = memref.load %arg1[%c0_114, %346] : memref<4x16xi32, #tpu.memory_space<smem>>
    %348 = arith.index_cast %347 : i32 to index
    %c0_115 = arith.constant 0 : index
    %349 = vector.load %arg3[%348, %c0_115] : memref<256x4xf32, #tpu.memory_space<vmem>>, vector<1x4xf32>
    %350 = vector.broadcast %345 : f32 to vector<1x4xf32>
    %351 = arith.mulf %350, %349 : vector<1x4xf32>
    %c1_116 = arith.constant 1 : index
    %352 = arith.index_cast %343 : i32 to index
    %353 = memref.load %arg2[%c1_116, %352] : memref<4x16xf32, #tpu.memory_space<smem>>
    %c1_117 = arith.constant 1 : index
    %354 = arith.index_cast %343 : i32 to index
    %355 = memref.load %arg1[%c1_117, %354] : memref<4x16xi32, #tpu.memory_space<smem>>
    %356 = arith.index_cast %355 : i32 to index
    %c0_118 = arith.constant 0 : index
    %357 = vector.load %arg3[%356, %c0_118] : memref<256x4xf32, #tpu.memory_space<vmem>>, vector<1x4xf32>
    %358 = vector.broadcast %353 : f32 to vector<1x4xf32>
    %359 = arith.mulf %358, %357 : vector<1x4xf32>
    %360 = arith.addf %351, %359 : vector<1x4xf32>
    %c2_119 = arith.constant 2 : index
    %361 = arith.index_cast %343 : i32 to index
    %362 = memref.load %arg2[%c2_119, %361] : memref<4x16xf32, #tpu.memory_space<smem>>
    %c2_120 = arith.constant 2 : index
    %363 = arith.index_cast %343 : i32 to index
    %364 = memref.load %arg1[%c2_120, %363] : memref<4x16xi32, #tpu.memory_space<smem>>
    %365 = arith.index_cast %364 : i32 to index
    %c0_121 = arith.constant 0 : index
    %366 = vector.load %arg3[%365, %c0_121] : memref<256x4xf32, #tpu.memory_space<vmem>>, vector<1x4xf32>
    %367 = vector.broadcast %362 : f32 to vector<1x4xf32>
    %368 = arith.mulf %367, %366 : vector<1x4xf32>
    %369 = arith.addf %360, %368 : vector<1x4xf32>
    %c3_122 = arith.constant 3 : index
    %370 = arith.index_cast %343 : i32 to index
    %371 = memref.load %arg2[%c3_122, %370] : memref<4x16xf32, #tpu.memory_space<smem>>
    %c3_123 = arith.constant 3 : index
    %372 = arith.index_cast %343 : i32 to index
    %373 = memref.load %arg1[%c3_123, %372] : memref<4x16xi32, #tpu.memory_space<smem>>
    %374 = arith.index_cast %373 : i32 to index
    %c0_124 = arith.constant 0 : index
    %375 = vector.load %arg3[%374, %c0_124] : memref<256x4xf32, #tpu.memory_space<vmem>>, vector<1x4xf32>
    %376 = vector.broadcast %371 : f32 to vector<1x4xf32>
    %377 = arith.mulf %376, %375 : vector<1x4xf32>
    %378 = arith.addf %369, %377 : vector<1x4xf32>
    %379 = arith.index_cast %c9_i32 : i32 to index
    %c0_125 = arith.constant 0 : index
    %380 = vector.load %arg4[%379, %c0_125] : memref<16x4xf32, #tpu.memory_space<vmem>>, vector<1x4xf32>
    tpu.vector_store %arg4[%379, %c0_125], %378 {strides = array<i32>} : memref<16x4xf32, #tpu.memory_space<vmem>>, vector<1x4xf32>,
    %c10_i32 = arith.constant 10 : i32
    %381 = arith.addi %0, %c10_i32 : i32
    %c0_126 = arith.constant 0 : index
    %382 = arith.index_cast %381 : i32 to index
    %383 = memref.load %arg2[%c0_126, %382] : memref<4x16xf32, #tpu.memory_space<smem>>
    %c0_127 = arith.constant 0 : index
    %384 = arith.index_cast %381 : i32 to index
    %385 = memref.load %arg1[%c0_127, %384] : memref<4x16xi32, #tpu.memory_space<smem>>
    %386 = arith.index_cast %385 : i32 to index
    %c0_128 = arith.constant 0 : index
    %387 = vector.load %arg3[%386, %c0_128] : memref<256x4xf32, #tpu.memory_space<vmem>>, vector<1x4xf32>
    %388 = vector.broadcast %383 : f32 to vector<1x4xf32>
    %389 = arith.mulf %388, %387 : vector<1x4xf32>
    %c1_129 = arith.constant 1 : index
    %390 = arith.index_cast %381 : i32 to index
    %391 = memref.load %arg2[%c1_129, %390] : memref<4x16xf32, #tpu.memory_space<smem>>
    %c1_130 = arith.constant 1 : index
    %392 = arith.index_cast %381 : i32 to index
    %393 = memref.load %arg1[%c1_130, %392] : memref<4x16xi32, #tpu.memory_space<smem>>
    %394 = arith.index_cast %393 : i32 to index
    %c0_131 = arith.constant 0 : index
    %395 = vector.load %arg3[%394, %c0_131] : memref<256x4xf32, #tpu.memory_space<vmem>>, vector<1x4xf32>
    %396 = vector.broadcast %391 : f32 to vector<1x4xf32>
    %397 = arith.mulf %396, %395 : vector<1x4xf32>
    %398 = arith.addf %389, %397 : vector<1x4xf32>
    %c2_132 = arith.constant 2 : index
    %399 = arith.index_cast %381 : i32 to index
    %400 = memref.load %arg2[%c2_132, %399] : memref<4x16xf32, #tpu.memory_space<smem>>
    %c2_133 = arith.constant 2 : index
    %401 = arith.index_cast %381 : i32 to index
    %402 = memref.load %arg1[%c2_133, %401] : memref<4x16xi32, #tpu.memory_space<smem>>
    %403 = arith.index_cast %402 : i32 to index
    %c0_134 = arith.constant 0 : index
    %404 = vector.load %arg3[%403, %c0_134] : memref<256x4xf32, #tpu.memory_space<vmem>>, vector<1x4xf32>
    %405 = vector.broadcast %400 : f32 to vector<1x4xf32>
    %406 = arith.mulf %405, %404 : vector<1x4xf32>
    %407 = arith.addf %398, %406 : vector<1x4xf32>
    %c3_135 = arith.constant 3 : index
    %408 = arith.index_cast %381 : i32 to index
    %409 = memref.load %arg2[%c3_135, %408] : memref<4x16xf32, #tpu.memory_space<smem>>
    %c3_136 = arith.constant 3 : index
    %410 = arith.index_cast %381 : i32 to index
    %411 = memref.load %arg1[%c3_136, %410] : memref<4x16xi32, #tpu.memory_space<smem>>
    %412 = arith.index_cast %411 : i32 to index
    %c0_137 = arith.constant 0 : index
    %413 = vector.load %arg3[%412, %c0_137] : memref<256x4xf32, #tpu.memory_space<vmem>>, vector<1x4xf32>
    %414 = vector.broadcast %409 : f32 to vector<1x4xf32>
    %415 = arith.mulf %414, %413 : vector<1x4xf32>
    %416 = arith.addf %407, %415 : vector<1x4xf32>
    %417 = arith.index_cast %c10_i32 : i32 to index
    %c0_138 = arith.constant 0 : index
    %418 = vector.load %arg4[%417, %c0_138] : memref<16x4xf32, #tpu.memory_space<vmem>>, vector<1x4xf32>
    tpu.vector_store %arg4[%417, %c0_138], %416 {strides = array<i32>} : memref<16x4xf32, #tpu.memory_space<vmem>>, vector<1x4xf32>,
    %c11_i32 = arith.constant 11 : i32
    %419 = arith.addi %0, %c11_i32 : i32
    %c0_139 = arith.constant 0 : index
    %420 = arith.index_cast %419 : i32 to index
    %421 = memref.load %arg2[%c0_139, %420] : memref<4x16xf32, #tpu.memory_space<smem>>
    %c0_140 = arith.constant 0 : index
    %422 = arith.index_cast %419 : i32 to index
    %423 = memref.load %arg1[%c0_140, %422] : memref<4x16xi32, #tpu.memory_space<smem>>
    %424 = arith.index_cast %423 : i32 to index
    %c0_141 = arith.constant 0 : index
    %425 = vector.load %arg3[%424, %c0_141] : memref<256x4xf32, #tpu.memory_space<vmem>>, vector<1x4xf32>
    %426 = vector.broadcast %421 : f32 to vector<1x4xf32>
    %427 = arith.mulf %426, %425 : vector<1x4xf32>
    %c1_142 = arith.constant 1 : index
    %428 = arith.index_cast %419 : i32 to index
    %429 = memref.load %arg2[%c1_142, %428] : memref<4x16xf32, #tpu.memory_space<smem>>
    %c1_143 = arith.constant 1 : index
    %430 = arith.index_cast %419 : i32 to index
    %431 = memref.load %arg1[%c1_143, %430] : memref<4x16xi32, #tpu.memory_space<smem>>
    %432 = arith.index_cast %431 : i32 to index
    %c0_144 = arith.constant 0 : index
    %433 = vector.load %arg3[%432, %c0_144] : memref<256x4xf32, #tpu.memory_space<vmem>>, vector<1x4xf32>
    %434 = vector.broadcast %429 : f32 to vector<1x4xf32>
    %435 = arith.mulf %434, %433 : vector<1x4xf32>
    %436 = arith.addf %427, %435 : vector<1x4xf32>
    %c2_145 = arith.constant 2 : index
    %437 = arith.index_cast %419 : i32 to index
    %438 = memref.load %arg2[%c2_145, %437] : memref<4x16xf32, #tpu.memory_space<smem>>
    %c2_146 = arith.constant 2 : index
    %439 = arith.index_cast %419 : i32 to index
    %440 = memref.load %arg1[%c2_146, %439] : memref<4x16xi32, #tpu.memory_space<smem>>
    %441 = arith.index_cast %440 : i32 to index
    %c0_147 = arith.constant 0 : index
    %442 = vector.load %arg3[%441, %c0_147] : memref<256x4xf32, #tpu.memory_space<vmem>>, vector<1x4xf32>
    %443 = vector.broadcast %438 : f32 to vector<1x4xf32>
    %444 = arith.mulf %443, %442 : vector<1x4xf32>
    %445 = arith.addf %436, %444 : vector<1x4xf32>
    %c3_148 = arith.constant 3 : index
    %446 = arith.index_cast %419 : i32 to index
    %447 = memref.load %arg2[%c3_148, %446] : memref<4x16xf32, #tpu.memory_space<smem>>
    %c3_149 = arith.constant 3 : index
    %448 = arith.index_cast %419 : i32 to index
    %449 = memref.load %arg1[%c3_149, %448] : memref<4x16xi32, #tpu.memory_space<smem>>
    %450 = arith.index_cast %449 : i32 to index
    %c0_150 = arith.constant 0 : index
    %451 = vector.load %arg3[%450, %c0_150] : memref<256x4xf32, #tpu.memory_space<vmem>>, vector<1x4xf32>
    %452 = vector.broadcast %447 : f32 to vector<1x4xf32>
    %453 = arith.mulf %452, %451 : vector<1x4xf32>
    %454 = arith.addf %445, %453 : vector<1x4xf32>
    %455 = arith.index_cast %c11_i32 : i32 to index
    %c0_151 = arith.constant 0 : index
    %456 = vector.load %arg4[%455, %c0_151] : memref<16x4xf32, #tpu.memory_space<vmem>>, vector<1x4xf32>
    tpu.vector_store %arg4[%455, %c0_151], %454 {strides = array<i32>} : memref<16x4xf32, #tpu.memory_space<vmem>>, vector<1x4xf32>,
    %c12_i32 = arith.constant 12 : i32
    %457 = arith.addi %0, %c12_i32 : i32
    %c0_152 = arith.constant 0 : index
    %458 = arith.index_cast %457 : i32 to index
    %459 = memref.load %arg2[%c0_152, %458] : memref<4x16xf32, #tpu.memory_space<smem>>
    %c0_153 = arith.constant 0 : index
    %460 = arith.index_cast %457 : i32 to index
    %461 = memref.load %arg1[%c0_153, %460] : memref<4x16xi32, #tpu.memory_space<smem>>
    %462 = arith.index_cast %461 : i32 to index
    %c0_154 = arith.constant 0 : index
    %463 = vector.load %arg3[%462, %c0_154] : memref<256x4xf32, #tpu.memory_space<vmem>>, vector<1x4xf32>
    %464 = vector.broadcast %459 : f32 to vector<1x4xf32>
    %465 = arith.mulf %464, %463 : vector<1x4xf32>
    %c1_155 = arith.constant 1 : index
    %466 = arith.index_cast %457 : i32 to index
    %467 = memref.load %arg2[%c1_155, %466] : memref<4x16xf32, #tpu.memory_space<smem>>
    %c1_156 = arith.constant 1 : index
    %468 = arith.index_cast %457 : i32 to index
    %469 = memref.load %arg1[%c1_156, %468] : memref<4x16xi32, #tpu.memory_space<smem>>
    %470 = arith.index_cast %469 : i32 to index
    %c0_157 = arith.constant 0 : index
    %471 = vector.load %arg3[%470, %c0_157] : memref<256x4xf32, #tpu.memory_space<vmem>>, vector<1x4xf32>
    %472 = vector.broadcast %467 : f32 to vector<1x4xf32>
    %473 = arith.mulf %472, %471 : vector<1x4xf32>
    %474 = arith.addf %465, %473 : vector<1x4xf32>
    %c2_158 = arith.constant 2 : index
    %475 = arith.index_cast %457 : i32 to index
    %476 = memref.load %arg2[%c2_158, %475] : memref<4x16xf32, #tpu.memory_space<smem>>
    %c2_159 = arith.constant 2 : index
    %477 = arith.index_cast %457 : i32 to index
    %478 = memref.load %arg1[%c2_159, %477] : memref<4x16xi32, #tpu.memory_space<smem>>
    %479 = arith.index_cast %478 : i32 to index
    %c0_160 = arith.constant 0 : index
    %480 = vector.load %arg3[%479, %c0_160] : memref<256x4xf32, #tpu.memory_space<vmem>>, vector<1x4xf32>
    %481 = vector.broadcast %476 : f32 to vector<1x4xf32>
    %482 = arith.mulf %481, %480 : vector<1x4xf32>
    %483 = arith.addf %474, %482 : vector<1x4xf32>
    %c3_161 = arith.constant 3 : index
    %484 = arith.index_cast %457 : i32 to index
    %485 = memref.load %arg2[%c3_161, %484] : memref<4x16xf32, #tpu.memory_space<smem>>
    %c3_162 = arith.constant 3 : index
    %486 = arith.index_cast %457 : i32 to index
    %487 = memref.load %arg1[%c3_162, %486] : memref<4x16xi32, #tpu.memory_space<smem>>
    %488 = arith.index_cast %487 : i32 to index
    %c0_163 = arith.constant 0 : index
    %489 = vector.load %arg3[%488, %c0_163] : memref<256x4xf32, #tpu.memory_space<vmem>>, vector<1x4xf32>
    %490 = vector.broadcast %485 : f32 to vector<1x4xf32>
    %491 = arith.mulf %490, %489 : vector<1x4xf32>
    %492 = arith.addf %483, %491 : vector<1x4xf32>
    %493 = arith.index_cast %c12_i32 : i32 to index
    %c0_164 = arith.constant 0 : index
    %494 = vector.load %arg4[%493, %c0_164] : memref<16x4xf32, #tpu.memory_space<vmem>>, vector<1x4xf32>
    tpu.vector_store %arg4[%493, %c0_164], %492 {strides = array<i32>} : memref<16x4xf32, #tpu.memory_space<vmem>>, vector<1x4xf32>,
    %c13_i32 = arith.constant 13 : i32
    %495 = arith.addi %0, %c13_i32 : i32
    %c0_165 = arith.constant 0 : index
    %496 = arith.index_cast %495 : i32 to index
    %497 = memref.load %arg2[%c0_165, %496] : memref<4x16xf32, #tpu.memory_space<smem>>
    %c0_166 = arith.constant 0 : index
    %498 = arith.index_cast %495 : i32 to index
    %499 = memref.load %arg1[%c0_166, %498] : memref<4x16xi32, #tpu.memory_space<smem>>
    %500 = arith.index_cast %499 : i32 to index
    %c0_167 = arith.constant 0 : index
    %501 = vector.load %arg3[%500, %c0_167] : memref<256x4xf32, #tpu.memory_space<vmem>>, vector<1x4xf32>
    %502 = vector.broadcast %497 : f32 to vector<1x4xf32>
    %503 = arith.mulf %502, %501 : vector<1x4xf32>
    %c1_168 = arith.constant 1 : index
    %504 = arith.index_cast %495 : i32 to index
    %505 = memref.load %arg2[%c1_168, %504] : memref<4x16xf32, #tpu.memory_space<smem>>
    %c1_169 = arith.constant 1 : index
    %506 = arith.index_cast %495 : i32 to index
    %507 = memref.load %arg1[%c1_169, %506] : memref<4x16xi32, #tpu.memory_space<smem>>
    %508 = arith.index_cast %507 : i32 to index
    %c0_170 = arith.constant 0 : index
    %509 = vector.load %arg3[%508, %c0_170] : memref<256x4xf32, #tpu.memory_space<vmem>>, vector<1x4xf32>
    %510 = vector.broadcast %505 : f32 to vector<1x4xf32>
    %511 = arith.mulf %510, %509 : vector<1x4xf32>
    %512 = arith.addf %503, %511 : vector<1x4xf32>
    %c2_171 = arith.constant 2 : index
    %513 = arith.index_cast %495 : i32 to index
    %514 = memref.load %arg2[%c2_171, %513] : memref<4x16xf32, #tpu.memory_space<smem>>
    %c2_172 = arith.constant 2 : index
    %515 = arith.index_cast %495 : i32 to index
    %516 = memref.load %arg1[%c2_172, %515] : memref<4x16xi32, #tpu.memory_space<smem>>
    %517 = arith.index_cast %516 : i32 to index
    %c0_173 = arith.constant 0 : index
    %518 = vector.load %arg3[%517, %c0_173] : memref<256x4xf32, #tpu.memory_space<vmem>>, vector<1x4xf32>
    %519 = vector.broadcast %514 : f32 to vector<1x4xf32>
    %520 = arith.mulf %519, %518 : vector<1x4xf32>
    %521 = arith.addf %512, %520 : vector<1x4xf32>
    %c3_174 = arith.constant 3 : index
    %522 = arith.index_cast %495 : i32 to index
    %523 = memref.load %arg2[%c3_174, %522] : memref<4x16xf32, #tpu.memory_space<smem>>
    %c3_175 = arith.constant 3 : index
    %524 = arith.index_cast %495 : i32 to index
    %525 = memref.load %arg1[%c3_175, %524] : memref<4x16xi32, #tpu.memory_space<smem>>
    %526 = arith.index_cast %525 : i32 to index
    %c0_176 = arith.constant 0 : index
    %527 = vector.load %arg3[%526, %c0_176] : memref<256x4xf32, #tpu.memory_space<vmem>>, vector<1x4xf32>
    %528 = vector.broadcast %523 : f32 to vector<1x4xf32>
    %529 = arith.mulf %528, %527 : vector<1x4xf32>
    %530 = arith.addf %521, %529 : vector<1x4xf32>
    %531 = arith.index_cast %c13_i32 : i32 to index
    %c0_177 = arith.constant 0 : index
    %532 = vector.load %arg4[%531, %c0_177] : memref<16x4xf32, #tpu.memory_space<vmem>>, vector<1x4xf32>
    tpu.vector_store %arg4[%531, %c0_177], %530 {strides = array<i32>} : memref<16x4xf32, #tpu.memory_space<vmem>>, vector<1x4xf32>,
    %c14_i32 = arith.constant 14 : i32
    %533 = arith.addi %0, %c14_i32 : i32
    %c0_178 = arith.constant 0 : index
    %534 = arith.index_cast %533 : i32 to index
    %535 = memref.load %arg2[%c0_178, %534] : memref<4x16xf32, #tpu.memory_space<smem>>
    %c0_179 = arith.constant 0 : index
    %536 = arith.index_cast %533 : i32 to index
    %537 = memref.load %arg1[%c0_179, %536] : memref<4x16xi32, #tpu.memory_space<smem>>
    %538 = arith.index_cast %537 : i32 to index
    %c0_180 = arith.constant 0 : index
    %539 = vector.load %arg3[%538, %c0_180] : memref<256x4xf32, #tpu.memory_space<vmem>>, vector<1x4xf32>
    %540 = vector.broadcast %535 : f32 to vector<1x4xf32>
    %541 = arith.mulf %540, %539 : vector<1x4xf32>
    %c1_181 = arith.constant 1 : index
    %542 = arith.index_cast %533 : i32 to index
    %543 = memref.load %arg2[%c1_181, %542] : memref<4x16xf32, #tpu.memory_space<smem>>
    %c1_182 = arith.constant 1 : index
    %544 = arith.index_cast %533 : i32 to index
    %545 = memref.load %arg1[%c1_182, %544] : memref<4x16xi32, #tpu.memory_space<smem>>
    %546 = arith.index_cast %545 : i32 to index
    %c0_183 = arith.constant 0 : index
    %547 = vector.load %arg3[%546, %c0_183] : memref<256x4xf32, #tpu.memory_space<vmem>>, vector<1x4xf32>
    %548 = vector.broadcast %543 : f32 to vector<1x4xf32>
    %549 = arith.mulf %548, %547 : vector<1x4xf32>
    %550 = arith.addf %541, %549 : vector<1x4xf32>
    %c2_184 = arith.constant 2 : index
    %551 = arith.index_cast %533 : i32 to index
    %552 = memref.load %arg2[%c2_184, %551] : memref<4x16xf32, #tpu.memory_space<smem>>
    %c2_185 = arith.constant 2 : index
    %553 = arith.index_cast %533 : i32 to index
    %554 = memref.load %arg1[%c2_185, %553] : memref<4x16xi32, #tpu.memory_space<smem>>
    %555 = arith.index_cast %554 : i32 to index
    %c0_186 = arith.constant 0 : index
    %556 = vector.load %arg3[%555, %c0_186] : memref<256x4xf32, #tpu.memory_space<vmem>>, vector<1x4xf32>
    %557 = vector.broadcast %552 : f32 to vector<1x4xf32>
    %558 = arith.mulf %557, %556 : vector<1x4xf32>
    %559 = arith.addf %550, %558 : vector<1x4xf32>
    %c3_187 = arith.constant 3 : index
    %560 = arith.index_cast %533 : i32 to index
    %561 = memref.load %arg2[%c3_187, %560] : memref<4x16xf32, #tpu.memory_space<smem>>
    %c3_188 = arith.constant 3 : index
    %562 = arith.index_cast %533 : i32 to index
    %563 = memref.load %arg1[%c3_188, %562] : memref<4x16xi32, #tpu.memory_space<smem>>
    %564 = arith.index_cast %563 : i32 to index
    %c0_189 = arith.constant 0 : index
    %565 = vector.load %arg3[%564, %c0_189] : memref<256x4xf32, #tpu.memory_space<vmem>>, vector<1x4xf32>
    %566 = vector.broadcast %561 : f32 to vector<1x4xf32>
    %567 = arith.mulf %566, %565 : vector<1x4xf32>
    %568 = arith.addf %559, %567 : vector<1x4xf32>
    %569 = arith.index_cast %c14_i32 : i32 to index
    %c0_190 = arith.constant 0 : index
    %570 = vector.load %arg4[%569, %c0_190] : memref<16x4xf32, #tpu.memory_space<vmem>>, vector<1x4xf32>
    tpu.vector_store %arg4[%569, %c0_190], %568 {strides = array<i32>} : memref<16x4xf32, #tpu.memory_space<vmem>>, vector<1x4xf32>,
    %c15_i32 = arith.constant 15 : i32
    %571 = arith.addi %0, %c15_i32 : i32
    %c0_191 = arith.constant 0 : index
    %572 = arith.index_cast %571 : i32 to index
    %573 = memref.load %arg2[%c0_191, %572] : memref<4x16xf32, #tpu.memory_space<smem>>
    %c0_192 = arith.constant 0 : index
    %574 = arith.index_cast %571 : i32 to index
    %575 = memref.load %arg1[%c0_192, %574] : memref<4x16xi32, #tpu.memory_space<smem>>
    %576 = arith.index_cast %575 : i32 to index
    %c0_193 = arith.constant 0 : index
    %577 = vector.load %arg3[%576, %c0_193] : memref<256x4xf32, #tpu.memory_space<vmem>>, vector<1x4xf32>
    %578 = vector.broadcast %573 : f32 to vector<1x4xf32>
    %579 = arith.mulf %578, %577 : vector<1x4xf32>
    %c1_194 = arith.constant 1 : index
    %580 = arith.index_cast %571 : i32 to index
    %581 = memref.load %arg2[%c1_194, %580] : memref<4x16xf32, #tpu.memory_space<smem>>
    %c1_195 = arith.constant 1 : index
    %582 = arith.index_cast %571 : i32 to index
    %583 = memref.load %arg1[%c1_195, %582] : memref<4x16xi32, #tpu.memory_space<smem>>
    %584 = arith.index_cast %583 : i32 to index
    %c0_196 = arith.constant 0 : index
    %585 = vector.load %arg3[%584, %c0_196] : memref<256x4xf32, #tpu.memory_space<vmem>>, vector<1x4xf32>
    %586 = vector.broadcast %581 : f32 to vector<1x4xf32>
    %587 = arith.mulf %586, %585 : vector<1x4xf32>
    %588 = arith.addf %579, %587 : vector<1x4xf32>
    %c2_197 = arith.constant 2 : index
    %589 = arith.index_cast %571 : i32 to index
    %590 = memref.load %arg2[%c2_197, %589] : memref<4x16xf32, #tpu.memory_space<smem>>
    %c2_198 = arith.constant 2 : index
    %591 = arith.index_cast %571 : i32 to index
    %592 = memref.load %arg1[%c2_198, %591] : memref<4x16xi32, #tpu.memory_space<smem>>
    %593 = arith.index_cast %592 : i32 to index
    %c0_199 = arith.constant 0 : index
    %594 = vector.load %arg3[%593, %c0_199] : memref<256x4xf32, #tpu.memory_space<vmem>>, vector<1x4xf32>
    %595 = vector.broadcast %590 : f32 to vector<1x4xf32>
    %596 = arith.mulf %595, %594 : vector<1x4xf32>
    %597 = arith.addf %588, %596 : vector<1x4xf32>
    %c3_200 = arith.constant 3 : index
    %598 = arith.index_cast %571 : i32 to index
    %599 = memref.load %arg2[%c3_200, %598] : memref<4x16xf32, #tpu.memory_space<smem>>
    %c3_201 = arith.constant 3 : index
    %600 = arith.index_cast %571 : i32 to index
    %601 = memref.load %arg1[%c3_201, %600] : memref<4x16xi32, #tpu.memory_space<smem>>
    %602 = arith.index_cast %601 : i32 to index
    %c0_202 = arith.constant 0 : index
    %603 = vector.load %arg3[%602, %c0_202] : memref<256x4xf32, #tpu.memory_space<vmem>>, vector<1x4xf32>
    %604 = vector.broadcast %599 : f32 to vector<1x4xf32>
    %605 = arith.mulf %604, %603 : vector<1x4xf32>
    %606 = arith.addf %597, %605 : vector<1x4xf32>
    %607 = arith.index_cast %c15_i32 : i32 to index
    %c0_203 = arith.constant 0 : index
    %608 = vector.load %arg4[%607, %c0_203] : memref<16x4xf32, #tpu.memory_space<vmem>>, vector<1x4xf32>
    tpu.vector_store %arg4[%607, %c0_203], %606 {strides = array<i32>} : memref<16x4xf32, #tpu.memory_space<vmem>>, vector<1x4xf32>,
    %c16_i32_204 = arith.constant 16 : i32
    return
  }
  func.func @transform_0(%arg0: i32, %arg1: memref<4x16xi32, #tpu.memory_space<smem>>) -> (i32, i32) {
    %c0_i32 = arith.constant 0 : i32
    %c0_i32_0 = arith.constant 0 : i32
    %c0_i32_1 = arith.constant 0 : i32
    return %c0_i32, %c0_i32_0 : i32, i32
  }
  func.func @transform_1(%arg0: i32, %arg1: memref<4x16xi32, #tpu.memory_space<smem>>) -> (i32, i32) {
    %c0_i32 = arith.constant 0 : i32
    %c0_i32_0 = arith.constant 0 : i32
    %c0_i32_1 = arith.constant 0 : i32
    return %c0_i32, %c0_i32_0 : i32, i32
  }
  func.func @transform_2(%arg0: i32, %arg1: memref<4x16xi32, #tpu.memory_space<smem>>) -> (i32, i32) {
    %c0_i32 = arith.constant 0 : i32
    %c0_i32_0 = arith.constant 0 : i32
    return %arg0, %c0_i32 : i32, i32
  }
}

</mosaic_0001>

<bundles_post_ra>
// kernel: tpu_custom_call.1
= control target key start
LH: loop header
LB: loop body
LE: loop exit
PB: predicated region body
PF: predicated region fallthrough
CT: control target
= control target key end

     0   :  { %s1555_s0 = inlined_call_operand.vmem [shape: s32[4,16], index: 0, kind: input, shape index: {}]   ;;  %s1556_s1 = inlined_call_operand.vmem [shape: f32[4,16], index: 1, kind: input, shape index: {}]   ;;  %s1557_s2 = inlined_call_operand.vmem [shape: f32[256,4], index: 2, kind: input, shape index: {}]   ;;  %s1558_s3 = inlined_call_operand.vmem [shape: f32[16,4], index: 3, kind: output, shape index: {}]  }
   0x1   :  { %s8_s14 = sshll.u32 %s1555_s0, 4  ;;  %s9_s14 = int_to_ptr.vmem [resolvable:$true] %s8_s14 }
   0x2   :  { %s901_s15 = scalar_lea.vmem %s9_s14, 64  ;;  %p906_p1 = scmp.lt.s32.totalorder %s9_s14, %s9_s14 }
   0x3   :  { %p902_p0 = scmp.ne.s32.totalorder %s9_s14, %s901_s15  ;;  %p907_p2 = scmp.lt.s32.totalorder %s901_s15, %s901_s15 }
   0x5   :  { %p908_p3 = por %p907_p2, %p906_p1 }
   0x7   :  { %p909_p4 = pnand %p908_p3, %p902_p0 }
   0x9   :  { %912 = shalt.err (!%p909_p4)  }
   0xa   :  { %s929_s16 = smov [#allocation3]  }
   0xb   :  { %11 = dma.vmem_to_smem %s9_s14, 64, %s929_s16, [#allocation2] }
   0xc   :  { %925 = dma.done.wait [#allocation2], 64 }
   0xd   :  { %926 = vsyncadd [#allocation2], 4294967232 }
   0xe   :  { %13 = sfence }
   0xf   :  { %14 = vsyncpa [#allocation5], 0  ;;  %s21_s19 = sshll.u32 %s1556_s1, 4  ;;  %s22_s19 = int_to_ptr.vmem [resolvable:$true] %s21_s19 }
  0x10   :  { %s913_s0 = scalar_lea.vmem %s22_s19, 64  ;;  %p918_p6 = scmp.lt.s32.totalorder %s22_s19, %s22_s19 }
  0x11   :  { %p914_p5 = scmp.ne.s32.totalorder %s22_s19, %s913_s0  ;;  %p919_p7 = scmp.lt.s32.totalorder %s913_s0, %s913_s0 }
  0x13   :  { %p920_p8 = por %p919_p7, %p918_p6 }
  0x15   :  { %p921_p9 = pnand %p920_p8, %p914_p5 }
  0x17   :  { %924 = shalt.err (!%p921_p9)
}
  0x18   :  { %s930_s20 = smov [#allocation4]  }
  0x19   :  { %24 = dma.vmem_to_smem %s22_s19, 64, %s930_s20, [#allocation5]  }
  0x1a   :  { %927 = dma.done.wait [#allocation5], 64  }
  0x1b   :  { %928 = vsyncadd [#allocation5], 4294967232 }
  0x1c   :  { %30 = sfence }
  0x1d   :  { %s32_s21 = sld [smem:[#allocation4]]  ;;  %s957_s28 = sld [smem:[#allocation4 + $0x1]]  ;;  %vm72_vm0 = vcmask 24576  }
  0x1e   :  { %s33_s22 = sld [smem:[#allocation3]]  ;;  %s780_s29 = sld [smem:[#allocation3 + $0x1]] }
  0x1f   :  { %s773_s23 = sld [smem:[#allocation4 + $0x80]]  ;;  %s959_s30 = sld [smem:[#allocation4 + $0x81]] }
  0x20   :  { %s774_s24 = sld [smem:[#allocation3 + $0x80]]  ;;  %s961_s4 = sld [smem:[#allocation3 + $0x81]] }
  0x21   :  { %s775_s25 = sld [smem:[#allocation4 + $0x100]]  ;;  %s966_s8 = sld [smem:[#allocation4 + $0x101]] }
  0x22   :  { %s776_s26 = sld [smem:[#allocation3 + $0x100]]  ;;  %s971_s12 = sld [smem:[#allocation3 + $0x101]] }
  0x23   :  { %s777_s1 = sld [smem:[#allocation4 + $0x180]]  ;;  %v36_v0 = vstv %s32_s21  ;;  %s976_s16 = sld [smem:[#allocation4 + $0x181]]  ;;  %v79_v11 = vstv %s957_s28 }
  0x24   :  { %s778_s27 = sld [smem:[#allocation3 + $0x180]]  ;;  %s34_s7 = scalar_lea.vmem %s1557_s2, %s33_s22 }
  0x25   :  { %v35_v1 = vld [vmem:[%s34_s7] sm:$0x1]  ;;  %v49_v2 = vstv %s773_s23  ;;  %s981_s0 = sld [smem:[#allocation3 + $0x181]]  ;;  %s77_s22 = scalar_lea.vmem %s1557_s2, %s780_s29  ;;  %v92_v15 = vstv %s959_s30 }
  0x26   :  { %s47_s11 = scalar_lea.vmem %s1557_s2, %s774_s24  ;;  %v37_v3 = vmul.f32 %v36_v0, %v35_v1  ;;  %s987_s23 = sld [smem:[#allocation4 + $0x2]]  ;;  %v78_v14 = vld [vmem:[%s77_s22] sm:$0x1] }
  0x27   :  { %v48_v4 = vld [vmem:[%s47_s11] sm:$0x1]  ;;  %v59_v5 = vstv %s775_s25  ;;  %v80_v16 = vmul.f32 %v79_v11, %v78_v14  ;;  %v102_v18 = vstv %s966_s8  ;;  %s999_s28 = sld [smem:[#allocation3 + $0x82]]  ;;  %s1021_s13 = sld [smem:[#allocation3 + $0x3]] }
  0x28   :  { %s57_s15 = scalar_lea.vmem %s1557_s2, %s776_s26  ;;  %v50_v6 = vmul.f32 %v49_v2, %v48_v4  ;;  %s90_s26 = scalar_lea.vmem %s1557_s2, %s961_s4 }
  0x29   :  { %v58_v7 = vld [vmem:[%s57_s15] sm:$0x1]  ;;  %v69_v8 = vstv %s777_s1  ;;  %s994_s1 = sld [smem:[#allocation3 + $0x2]]  ;;  %s100_s6 = scalar_lea.vmem %s1557_s2, %s971_s12  ;;  %v112_v22 = vstv %s976_s16 }
  0x2a   :  { %s67_s19 = scalar_lea.vmem %s1557_s2, %s778_s27  ;;  %v60_v9 = vmul.f32 %v59_v5, %v58_v7  ;;  %v51_v12 = vadd.f32 %v50_v6, %v37_v3  ;;  %v91_v17 = vld [vmem:[%s90_s26] sm:$0x1]  ;;  %s997_s27 = sld [smem:[#allocation4 + $0x82]] }
  0x2b   :  { %v68_v10 = vld [vmem:[%s67_s19] sm:$0x1]  ;;  %v93_v20 = vmul.f32 %v92_v15, %v91_v17  ;;  %s1005_s4 = sld [smem:[#allocation4 + $0x102]]  ;;  %s110_s10 = scalar_lea.vmem %s1557_s2, %s981_s0 }
  0x2c   :  { %v70_v13 = vmul.f32 %v69_v8, %v68_v10  ;;  %v61_v19 = vadd.f32 %v60_v9, %v51_v12  ;;  %v101_v21 = vld [vmem:[%s100_s6] sm:$0x1]  ;;  %s1008_s30 = sld [smem:[#allocation3 + $0x102]]  ;;  %v121_v27 = vstv %s987_s23  ;;  %s1019_s12 = sld [smem:[#allocation4 + $0x3]] }
  0x2d   :  { %s1010_s7 = sld [smem:[#allocation4 + $0x182]]  ;;  %v94_v24 = vadd.f32 %v93_v20, %v80_v16  ;;  %v103_v25 = vmul.f32 %v102_v18, %v101_v21  ;;  %v111_v26 = vld [vmem:[%s110_s10] sm:$0x1]  ;;  %s1031_s19 = sld [smem:[#allocation4 + $0x83]] }
  0x2e   :  { %v71_v23 = vadd.f32 %v70_v13, %v61_v19  ;;  %s1016_s11 = sld [smem:[#allocation3 + $0x182]]  ;;  %v113_v29 = vmul.f32 %v112_v22, %v111_v26  ;;  %s132_s21 = scalar_lea.vmem %s1557_s2, %s999_s28 }
  0x2f   :  { %v104_v28 = vadd.f32 %v103_v25, %v94_v24  ;;  %s119_s18 = scalar_lea.vmem %s1557_s2, %s994_s1  ;;  %s1038_s22 = sld [smem:[#allocation3 + $0x83]]  ;;  %v133_v34 = vld [vmem:[%s132_s21] sm:$0x1] }
  0x30   :  { %73 = vst.msk [vmem:[%s1558_s3] sm:$0x1] %vm72_vm0, %v71_v23  ;;  %v120_v30 = vld [vmem:[%s119_s18] sm:$0x1]  ;;  %v134_v31 = vstv %s997_s27  ;;  %s1041_s23 = sld [smem:[#allocation4 + $0x103]]  ;;  %s161_s9 = scalar_lea.vmem %s1557_s2, %s1021_s13 }
  0x31   :  { %v114_v32 = vadd.f32 %v113_v29, %v104_v28  ;;  %v122_v33 = vmul.f32 %v121_v27, %v120_v30  ;;  %v144_v35 = vstv %s1005_s4  ;;  %s1043_s24 = sld [smem:[#allocation3 + $0x103]]  ;;  %v135_v36 = vmul.f32 %v134_v31, %v133_v34  ;;  %s1067_s10 = sld [smem:[#allocation4 + $0x4]]  ;;  %v162_v44 = vld [vmem:[%s161_s9] sm:$0x1] }
  0x32   :  { %s142_s1 = scalar_lea.vmem %s1557_s2, %s1008_s30  ;;  %s1050_s27 = sld [smem:[#allocation4 + $0x183]]  ;;  %v163_v42 = vstv %s1019_s12 }
  0x33   :  { %v154_v37 = vstv %s1010_s7  ;;  %115 = vst.msk [vmem:[%s1558_s3 + $0x1] sm:$0x1] %vm72_vm0, %v114_v32  ;;  %v143_v38 = vld [vmem:[%s142_s1] sm:$0x1]  ;;  %s1060_s8 = sld [smem:[#allocation3 + $0x183]]  ;;  %v136_v39 = vadd.f32 %v135_v36, %v122_v33  ;;  %v176_v45 = vstv %s1031_s19  ;;  %s1070_s14 = sld [smem:[#allocation3 + $0x4]]  ;;  %v164_v47 = vmul.f32 %v163_v42, %v162_v44 }
  0x34   :  { %s152_s4 = scalar_lea.vmem %s1557_s2, %s1016_s11  ;;  %v145_v40 = vmul.f32 %v144_v35, %v143_v38  ;;  %s1072_s11 = sld [smem:[#allocation4 + $0x84]] }
  0x35   :  { %v153_v41 = vld [vmem:[%s152_s4] sm:$0x1]  ;;  %s174_s17 = scalar_lea.vmem %s1557_s2, %s1038_s22  ;;  %s1078_s18 = sld [smem:[#allocation3 + $0x84]] }
  0x36   :  { %v155_v43 = vmul.f32 %v154_v37, %v153_v41  ;;  %v146_v46 = vadd.f32 %v145_v40, %v136_v39  ;;  %v175_v48 = vld [vmem:[%s174_s17] sm:$0x1]  ;;  %v186_v49 = vstv %s1041_s23  ;;  %s1085_s19 = sld [smem:[#allocation4 + $0x104]]  ;;  %s1105_s28 = sld [smem:[#allocation3 + $0x5]] }
  0x37   :  { %s184_s0 = scalar_lea.vmem %s1557_s2, %s1043_s24  ;;  %v177_v51 = vmul.f32 %v176_v45, %v175_v48  ;;  %s1088_s20 = sld [smem:[#allocation3 + $0x104]]  ;;  %v205_v57 = vstv %s1067_s10 }
  0x38   :  { %v156_v50 = vadd.f32 %v155_v43, %v146_v46  ;;  %v185_v52 = vld [vmem:[%s184_s0] sm:$0x1]  ;;  %v196_v53 = vstv %s1050_s27  ;;  %s1090_s21 = sld [smem:[#allocation4 + $0x184]]  ;;  %s1103_s27 = sld [smem:[#allocation4 + $0x5]] }
  0x39   :  { %v187_v54 = vmul.f32 %v186_v49, %v185_v52  ;;  %s194_s26 = scalar_lea.vmem %s1557_s2, %s1060_s8  ;;  %s1096_s24 = sld [smem:[#allocation3 + $0x184]]  ;;  %v178_v55 = vadd.f32 %v177_v51, %v164_v47 }
  0x3a   :  { %157 = vst.msk [vmem:[%s1558_s3 + $0x2] sm:$0x1] %vm72_vm0, %v156_v50  ;;  %v195_v56 = vld [vmem:[%s194_s26] sm:$0x1]  ;;  %s203_s6 = scalar_lea.vmem %s1557_s2, %s1070_s14  ;;  %v218_v59 = vstv %s1072_s11  ;;  %s1112_s4 = sld [smem:[#allocation4 + $0x85]] }
  0x3b   :  { %v197_v58 = vmul.f32 %v196_v53, %v195_v56  ;;  %v188_v60 = vadd.f32 %v187_v54, %v178_v55  ;;  %v204_v61 = vld [vmem:[%s203_s6] sm:$0x1]  ;;  %s216_s7 = scalar_lea.vmem %s1557_s2, %s1078_s18  ;;  %s1118_s9 = sld [smem:[#allocation3 + $0x85]] }
  0x3c   :  { %v206_v62 = vmul.f32 %v205_v57, %v204_v61  ;;  %v217_v63 = vld [vmem:[%s216_s7] sm:$0x1]  ;;  %v228_v0 = vstv %s1085_s19  ;;  %s1121_s10 = sld [smem:[#allocation4 + $0x105]]  ;;  %s245_s25 = scalar_lea.vmem %s1557_s2, %s1105_s28 }
  0x3d   :  { %s1123_s14 = sld [smem:[#allocation3 + $0x105]]  ;;  %v198_v1 = vadd.f32 %v197_v58, %v188_v60  ;;  %v219_v2 = vmul.f32 %v218_v59, %v217_v63  ;;  %s226_s16 = scalar_lea.vmem %s1557_s2, %s1088_s20  ;;  %v246_v10 = vld [vmem:[%s245_s25] sm:$0x1] }
  0x3e   :  { %v238_v3 = vstv %s1090_s21  ;;  %s1130_s17 = sld [smem:[#allocation4 + $0x185]]  ;;  %v227_v4 = vld [vmem:[%s226_s16] sm:$0x1]  ;;  %v247_v8 = vstv %s1103_s27  ;;  %s1147_s26 = sld [smem:[#allocation4 + $0x6]] }
  0x3f   :  { %s236_s13 = scalar_lea.vmem %s1557_s2, %s1096_s24  ;;  %s1136_s0 = sld [smem:[#allocation3 + $0x185]]  ;;  %199 = vst.msk [vmem:[%s1558_s3 + $0x3] sm:$0x1] %vm72_vm0, %v198_v1  ;;  %v220_v5 = vadd.f32 %v219_v2, %v206_v62  ;;  %v229_v6 = vmul.f32 %v228_v0, %v227_v4  ;;  %v248_v13 = vmul.f32 %v247_v8, %v246_v10 }
  0x40   :  { %v237_v7 = vld [vmem:[%s236_s13] sm:$0x1]  ;;  %v260_v11 = vstv %s1112_s4  ;;  %s1150_s24 = sld [smem:[#allocation3 + $0x6]]  ;;  %s1185_s18 = sld [smem:[#allocation3 + $0x7]] }
  0x41   :  { %v239_v9 = vmul.f32 %v238_v3, %v237_v7  ;;  %s1152_s23 = sld [smem:[#allocation4 + $0x86]]  ;;  %v230_v12 = vadd.f32 %v229_v6, %v220_v5  ;;  %s258_s5 = scalar_lea.vmem %s1557_s2, %s1118_s9 }
  0x42   :  { %s1158_s6 = sld [smem:[#allocation3 + $0x86]]  ;;  %v259_v14 = vld [vmem:[%s258_s5] sm:$0x1]  ;;  %v270_v15 = vstv %s1121_s10  ;;  %s1192_s19 = sld [smem:[#allocation4 + $0x87]] }
  0x43   :  { %s268_s8 = scalar_lea.vmem %s1557_s2, %s1123_s14  ;;  %s1165_s4 = sld [smem:[#allocation4 + $0x106]]  ;;  %v240_v16 = vadd.f32 %v239_v9, %v230_v12  ;;  %v261_v17 = vmul.f32 %v260_v11, %v259_v14 }
  0x44   :  { %v269_v18 = vld [vmem:[%s268_s8] sm:$0x1]  ;;  %v280_v19 = vstv %s1130_s17  ;;  %s1168_s30 = sld [smem:[#allocation3 + $0x106]]  ;;  %v289_v23 = vstv %s1147_s26  ;;  %s1183_s17 = sld [smem:[#allocation4 + $0x7]] }
  0x45   :  { %s1170_s7 = sld [smem:[#allocation4 + $0x186]]  ;;  %v271_v20 = vmul.f32 %v270_v15, %v269_v18  ;;  %s278_s15 = scalar_lea.vmem %s1557_s2, %s1136_s0  ;;  %241 = vst.msk [vmem:[%s1558_s3 + $0x4] sm:$0x1] %vm72_vm0, %v240_v16  ;;  %v262_v21 = vadd.f32 %v261_v17, %v248_v13 }
  0x46   :  { %s1176_s14 = sld [smem:[#allocation3 + $0x186]]  ;;  %v279_v22 = vld [vmem:[%s278_s15] sm:$0x1]  ;;  %s287_s0 = scalar_lea.vmem %s1557_s2, %s1150_s24 }
  0x47   :  { %v281_v24 = vmul.f32 %v280_v19, %v279_v22  ;;  %v302_v25 = vstv %s1152_s23  ;;  %v272_v26 = vadd.f32 %v271_v20, %v262_v21  ;;  %v288_v27 = vld [vmem:[%s287_s0] sm:$0x1]  ;;  %s1198_s25 = sld [smem:[#allocation3 + $0x87]]  ;;  %s329_s11 = scalar_lea.vmem %s1557_s2, %s1185_s18 }
  0x48   :  { %s300_s21 = scalar_lea.vmem %s1557_s2, %s1158_s6  ;;  %v290_v28 = vmul.f32 %v289_v23, %v288_v27  ;;  %s1201_s26 = sld [smem:[#allocation4 + $0x107]]  ;;  %v330_v40 = vld [vmem:[%s329_s11] sm:$0x1]  ;;  %v344_v41 = vstv %s1192_s19 }
  0x49   :  { %v301_v29 = vld [vmem:[%s300_s21] sm:$0x1]  ;;  %v312_v30 = vstv %s1165_s4  ;;  %s1203_s24 = sld [smem:[#allocation3 + $0x107]]  ;;  %v282_v31 = vadd.f32 %v281_v24, %v272_v26  ;;  %s1227_s15 = sld [smem:[#allocation4 + $0x8]] }
  0x4a   :  { %v303_v32 = vmul.f32 %v302_v25, %v301_v29  ;;  %s310_s29 = scalar_lea.vmem %s1557_s2, %s1168_s30  ;;  %s1210_s5 = sld [smem:[#allocation4 + $0x187]]  ;;  %v331_v38 = vstv %s1183_s17 }
  0x4b   :  { %v322_v33 = vstv %s1170_s7  ;;  %v311_v34 = vld [vmem:[%s310_s29] sm:$0x1]  ;;  %s1216_s8 = sld [smem:[#allocation3 + $0x187]]  ;;  %283 = vst.msk [vmem:[%s1558_s3 + $0x5] sm:$0x1] %vm72_vm0, %v282_v31  ;;  %s1232_s10 = sld [smem:[#allocation4 + $0x88]]  ;;  %v332_v43 = vmul.f32 %v331_v38, %v330_v40 }
  0x4c   :  { %s320_s28 = scalar_lea.vmem %s1557_s2, %s1176_s14  ;;  %v304_v35 = vadd.f32 %v303_v32, %v290_v28  ;;  %v313_v36 = vmul.f32 %v312_v30, %v311_v34  ;;  %s1230_s14 = sld [smem:[#allocation3 + $0x8]] }
  0x4d   :  { %v321_v37 = vld [vmem:[%s320_s28] sm:$0x1]  ;;  %s342_s13 = scalar_lea.vmem %s1557_s2, %s1198_s25  ;;  %s1238_s0 = sld [smem:[#allocation3 + $0x88]] }
  0x4e   :  { %v323_v39 = vmul.f32 %v322_v33, %v321_v37  ;;  %v314_v42 = vadd.f32 %v313_v36, %v304_v35  ;;  %v343_v44 = vld [vmem:[%s342_s13] sm:$0x1]  ;;  %v354_v45 = vstv %s1201_s26  ;;  %s1245_s19 = sld [smem:[#allocation4 + $0x108]]  ;;  %s1265_s6 = sld [smem:[#allocation3 + $0x9]] }
  0x4f   :  { %s352_s22 = scalar_lea.vmem %s1557_s2, %s1203_s24  ;;  %v345_v47 = vmul.f32 %v344_v41, %v343_v44  ;;  %s1248_s20 = sld [smem:[#allocation3 + $0x108]]  ;;  %v373_v53 = vstv %s1227_s15 }
  0x50   :  { %v324_v46 = vadd.f32 %v323_v39, %v314_v42  ;;  %v353_v48 = vld [vmem:[%s352_s22] sm:$0x1]  ;;  %v364_v49 = vstv %s1210_s5  ;;  %s1250_s21 = sld [smem:[#allocation4 + $0x188]]  ;;  %s1263_s5 = sld [smem:[#allocation4 + $0x9]] }
  0x51   :  { %v355_v50 = vmul.f32 %v354_v45, %v353_v48  ;;  %s362_s1 = scalar_lea.vmem %s1557_s2, %s1216_s8  ;;  %s1256_s24 = sld [smem:[#allocation3 + $0x188]]  ;;  %v346_v51 = vadd.f32 %v345_v47, %v332_v43  ;;  %v386_v55 = vstv %s1232_s10 }
  0x52   :  { %325 = vst.msk [vmem:[%s1558_s3 + $0x6] sm:$0x1] %vm72_vm0, %v324_v46  ;;  %v363_v52 = vld [vmem:[%s362_s1] sm:$0x1]  ;;  %s371_s8 = scalar_lea.vmem %s1557_s2, %s1230_s14  ;;  %s1272_s4 = sld [smem:[#allocation4 + $0x89]] }
  0x53   :  { %v365_v54 = vmul.f32 %v364_v49, %v363_v52  ;;  %v356_v56 = vadd.f32 %v355_v50, %v346_v51  ;;  %v372_v57 = vld [vmem:[%s371_s8] sm:$0x1]  ;;  %s384_s7 = scalar_lea.vmem %s1557_s2, %s1238_s0  ;;  %s1278_s11 = sld [smem:[#allocation3 + $0x89]] }
  0x54   :  { %v374_v58 = vmul.f32 %v373_v53, %v372_v57  ;;  %v385_v59 = vld [vmem:[%s384_s7] sm:$0x1]  ;;  %v396_v60 = vstv %s1245_s19  ;;  %s1281_s15 = sld [smem:[#allocation4 + $0x109]]  ;;  %s413_s23 = scalar_lea.vmem %s1557_s2, %s1265_s6 }
  0x55   :  { %s1283_s14 = sld [smem:[#allocation3 + $0x109]]  ;;  %v366_v61 = vadd.f32 %v365_v54, %v356_v56  ;;  %v387_v62 = vmul.f32 %v386_v55, %v385_v59  ;;  %s394_s12 = scalar_lea.vmem %s1557_s2, %s1248_s20  ;;  %v414_v6 = vld [vmem:[%s413_s23] sm:$0x1] }
  0x56   :  { %v406_v63 = vstv %s1250_s21  ;;  %s1290_s13 = sld [smem:[#allocation4 + $0x189]]  ;;  %v395_v0 = vld [vmem:[%s394_s12] sm:$0x1]  ;;  %v415_v4 = vstv %s1263_s5  ;;  %s1307_s1 = sld [smem:[#allocation4 + $0xa]] }
  0x57   :  { %s404_s18 = scalar_lea.vmem %s1557_s2, %s1256_s24  ;;  %s1296_s22 = sld [smem:[#allocation3 + $0x189]]  ;;  %367 = vst.msk [vmem:[%s1558_s3 + $0x7] sm:$0x1] %vm72_vm0, %v366_v61  ;;  %v388_v1 = vadd.f32 %v387_v62, %v374_v58  ;;  %v397_v2 = vmul.f32 %v396_v60, %v395_v0  ;;  %v416_v9 = vmul.f32 %v415_v4, %v414_v6 }
  0x58   :  { %v405_v3 = vld [vmem:[%s404_s18] sm:$0x1]  ;;  %v428_v7 = vstv %s1272_s4  ;;  %s1310_s24 = sld [smem:[#allocation3 + $0xa]]  ;;  %s1345_s0 = sld [smem:[#allocation3 + $0xb]] }
  0x59   :  { %v407_v5 = vmul.f32 %v406_v63, %v405_v3  ;;  %s1312_s26 = sld [smem:[#allocation4 + $0x8a]]  ;;  %v398_v8 = vadd.f32 %v397_v2, %v388_v1  ;;  %s426_s28 = scalar_lea.vmem %s1557_s2, %s1278_s11 }
  0x5a   :  { %s1318_s8 = sld [smem:[#allocation3 + $0x8a]]  ;;  %v427_v10 = vld [vmem:[%s426_s28] sm:$0x1]  ;;  %v438_v11 = vstv %s1281_s15  ;;  %s1352_s19 = sld [smem:[#allocation4 + $0x8b]] }
  0x5b   :  { %s436_s9 = scalar_lea.vmem %s1557_s2, %s1283_s14  ;;  %s1325_s4 = sld [smem:[#allocation4 + $0x10a]]  ;;  %v408_v12 = vadd.f32 %v407_v5, %v398_v8  ;;  %v429_v13 = vmul.f32 %v428_v7, %v427_v10 }
  0x5c   :  { %v437_v14 = vld [vmem:[%s436_s9] sm:$0x1]  ;;  %v448_v15 = vstv %s1290_s13  ;;  %s1328_s30 = sld [smem:[#allocation3 + $0x10a]]  ;;  %v457_v19 = vstv %s1307_s1  ;;  %s1343_s13 = sld [smem:[#allocation4 + $0xb]] }
  0x5d   :  { %s1330_s7 = sld [smem:[#allocation4 + $0x18a]]  ;;  %v439_v16 = vmul.f32 %v438_v11, %v437_v14  ;;  %s446_s16 = scalar_lea.vmem %s1557_s2, %s1296_s22  ;;  %409 = vst.msk [vmem:[%s1558_s3 + $0x8] sm:$0x1] %vm72_vm0, %v408_v12  ;;  %v430_v17 = vadd.f32 %v429_v13, %v416_v9 }
  0x5e   :  { %s1336_s14 = sld [smem:[#allocation3 + $0x18a]]  ;;  %v447_v18 = vld [vmem:[%s446_s16] sm:$0x1]  ;;  %s455_s22 = scalar_lea.vmem %s1557_s2, %s1310_s24 }
  0x5f   :  { %v449_v20 = vmul.f32 %v448_v15, %v447_v18  ;;  %v470_v21 = vstv %s1312_s26  ;;  %v440_v22 = vadd.f32 %v439_v16, %v430_v17  ;;  %v456_v23 = vld [vmem:[%s455_s22] sm:$0x1]  ;;  %s1358_s23 = sld [smem:[#allocation3 + $0x8b]]  ;;  %s497_s10 = scalar_lea.vmem %s1557_s2, %s1345_s0 }
  0x60   :  { %s468_s21 = scalar_lea.vmem %s1557_s2, %s1318_s8  ;;  %v458_v24 = vmul.f32 %v457_v19, %v456_v23  ;;  %s1361_s1 = sld [smem:[#allocation4 + $0x10b]]  ;;  %v498_v36 = vld [vmem:[%s497_s10] sm:$0x1]  ;;  %v512_v37 = vstv %s1352_s19 }
  0x61   :  { %v469_v25 = vld [vmem:[%s468_s21] sm:$0x1]  ;;  %v480_v26 = vstv %s1325_s4  ;;  %s1363_s24 = sld [smem:[#allocation3 + $0x10b]]  ;;  %v450_v27 = vadd.f32 %v449_v20, %v440_v22  ;;  %s1387_s16 = sld [smem:[#allocation4 + $0xc]] }
  0x62   :  { %v471_v28 = vmul.f32 %v470_v21, %v469_v25  ;;  %s478_s27 = scalar_lea.vmem %s1557_s2, %s1328_s30  ;;  %s1370_s28 = sld [smem:[#allocation4 + $0x18b]]  ;;  %v499_v34 = vstv %s1343_s13 }
  0x63   :  { %v490_v29 = vstv %s1330_s7  ;;  %v479_v30 = vld [vmem:[%s478_s27] sm:$0x1]  ;;  %s1376_s9 = sld [smem:[#allocation3 + $0x18b]]  ;;  %451 = vst.msk [vmem:[%s1558_s3 + $0x9] sm:$0x1] %vm72_vm0, %v450_v27  ;;  %s1392_s15 = sld [smem:[#allocation4 + $0x8c]]  ;;  %v500_v39 = vmul.f32 %v499_v34, %v498_v36 }
  0x64   :  { %s488_s6 = scalar_lea.vmem %s1557_s2, %s1336_s14  ;;  %v472_v31 = vadd.f32 %v471_v28, %v458_v24  ;;  %v481_v32 = vmul.f32 %v480_v26, %v479_v30  ;;  %s1390_s14 = sld [smem:[#allocation3 + $0xc]] }
  0x65   :  { %v489_v33 = vld [vmem:[%s488_s6] sm:$0x1]  ;;  %s510_s18 = scalar_lea.vmem %s1557_s2, %s1358_s23  ;;  %s1398_s22 = sld [smem:[#allocation3 + $0x8c]] }
  0x66   :  { %v491_v35 = vmul.f32 %v490_v29, %v489_v33  ;;  %v482_v38 = vadd.f32 %v481_v32, %v472_v31  ;;  %v511_v40 = vld [vmem:[%s510_s18] sm:$0x1]  ;;  %v522_v41 = vstv %s1361_s1  ;;  %s1405_s19 = sld [smem:[#allocation4 + $0x10c]]  ;;  %s1425_s8 = sld [smem:[#allocation3 + $0xd]] }
  0x67   :  { %s520_s25 = scalar_lea.vmem %s1557_s2, %s1363_s24  ;;  %v513_v43 = vmul.f32 %v512_v37, %v511_v40  ;;  %s1408_s20 = sld [smem:[#allocation3 + $0x10c]]  ;;  %v541_v49 = vstv %s1387_s16 }
  0x68   :  { %v492_v42 = vadd.f32 %v491_v35, %v482_v38  ;;  %v521_v44 = vld [vmem:[%s520_s25] sm:$0x1]  ;;  %v532_v45 = vstv %s1370_s28  ;;  %s1410_s21 = sld [smem:[#allocation4 + $0x18c]]  ;;  %s1423_s28 = sld [smem:[#allocation4 + $0xd]] }
  0x69   :  { %v523_v46 = vmul.f32 %v522_v41, %v521_v44  ;;  %s530_s29 = scalar_lea.vmem %s1557_s2, %s1376_s9  ;;  %s1416_s24 = sld [smem:[#allocation3 + $0x18c]]  ;;  %v514_v47 = vadd.f32 %v513_v43, %v500_v39  ;;  %v554_v51 = vstv %s1392_s15 }
  0x6a   :  { %493 = vst.msk [vmem:[%s1558_s3 + $0xa] sm:$0x1] %vm72_vm0, %v492_v42  ;;  %v531_v48 = vld [vmem:[%s530_s29] sm:$0x1]  ;;  %s539_s9 = scalar_lea.vmem %s1557_s2, %s1390_s14  ;;  %s1432_s4 = sld [smem:[#allocation4 + $0x8d]] }
  0x6b   :  { %v533_v50 = vmul.f32 %v532_v45, %v531_v48  ;;  %v524_v52 = vadd.f32 %v523_v46, %v514_v47  ;;  %v540_v53 = vld [vmem:[%s539_s9] sm:$0x1]  ;;  %s552_s7 = scalar_lea.vmem %s1557_s2, %s1398_s22  ;;  %s1438_s10 = sld [smem:[#allocation3 + $0x8d]] }
  0x6c   :  { %v542_v54 = vmul.f32 %v541_v49, %v540_v53  ;;  %v553_v55 = vld [vmem:[%s552_s7] sm:$0x1]  ;;  %v564_v56 = vstv %s1405_s19  ;;  %s1441_s16 = sld [smem:[#allocation4 + $0x10d]]  ;;  %s581_s26 = scalar_lea.vmem %s1557_s2, %s1425_s8 }
  0x6d   :  { %s1443_s14 = sld [smem:[#allocation3 + $0x10d]]  ;;  %v534_v57 = vadd.f32 %v533_v50, %v524_v52  ;;  %v555_v58 = vmul.f32 %v554_v51, %v553_v55  ;;  %s562_s17 = scalar_lea.vmem %s1557_s2, %s1408_s20  ;;  %v582_v2 = vld [vmem:[%s581_s26] sm:$0x1] }
  0x6e   :  { %v574_v59 = vstv %s1410_s21  ;;  %s1450_s18 = sld [smem:[#allocation4 + $0x18d]]  ;;  %v563_v60 = vld [vmem:[%s562_s17] sm:$0x1]  ;;  %v583_v0 = vstv %s1423_s28  ;;  %s1467_s29 = sld [smem:[#allocation4 + $0xe]] }
  0x6f   :  { %s572_s0 = scalar_lea.vmem %s1557_s2, %s1416_s24  ;;  %s1456_s25 = sld [smem:[#allocation3 + $0x18d]]  ;;  %535 = vst.msk [vmem:[%s1558_s3 + $0xb] sm:$0x1] %vm72_vm0, %v534_v57  ;;  %v556_v61 = vadd.f32 %v555_v58, %v542_v54  ;;  %v565_v62 = vmul.f32 %v564_v56, %v563_v60  ;;  %v584_v5 = vmul.f32 %v583_v0, %v582_v2 }
  0x70   :  { %v573_v63 = vld [vmem:[%s572_s0] sm:$0x1]  ;;  %v596_v3 = vstv %s1432_s4  ;;  %s1470_s24 = sld [smem:[#allocation3 + $0xe]]  ;;  %s1505_s22 = sld [smem:[#allocation3 + $0xf]] }
  0x71   :  { %v575_v1 = vmul.f32 %v574_v59, %v573_v63  ;;  %s1472_s1 = sld [smem:[#allocation4 + $0x8e]]  ;;  %v566_v4 = vadd.f32 %v565_v62, %v556_v61  ;;  %s594_s6 = scalar_lea.vmem %s1557_s2, %s1438_s10 }
  0x72   :  { %s1478_s9 = sld [smem:[#allocation3 + $0x8e]]  ;;  %v595_v6 = vld [vmem:[%s594_s6] sm:$0x1]  ;;  %v606_v7 = vstv %s1441_s16  ;;  %s1512_s19 = sld [smem:[#allocation4 + $0x8f]] }
  0x73   :  { %s604_s11 = scalar_lea.vmem %s1557_s2, %s1443_s14  ;;  %s1485_s4 = sld [smem:[#allocation4 + $0x10e]]  ;;  %v576_v8 = vadd.f32 %v575_v1, %v566_v4  ;;  %v597_v9 = vmul.f32 %v596_v3, %v595_v6 }
  0x74   :  { %v605_v10 = vld [vmem:[%s604_s11] sm:$0x1]  ;;  %v616_v11 = vstv %s1450_s18  ;;  %s1488_s30 = sld [smem:[#allocation3 + $0x10e]]  ;;  %v625_v15 = vstv %s1467_s29  ;;  %s1503_s18 = sld [smem:[#allocation4 + $0xf]] }
  0x75   :  { %s1490_s7 = sld [smem:[#allocation4 + $0x18e]]  ;;  %v607_v12 = vmul.f32 %v606_v7, %v605_v10  ;;  %s614_s12 = scalar_lea.vmem %s1557_s2, %s1456_s25  ;;  %577 = vst.msk [vmem:[%s1558_s3 + $0xc] sm:$0x1] %vm72_vm0, %v576_v8  ;;  %v598_v13 = vadd.f32 %v597_v9, %v584_v5 }
  0x76   :  { %s1496_s14 = sld [smem:[#allocation3 + $0x18e]]  ;;  %v615_v14 = vld [vmem:[%s614_s12] sm:$0x1]  ;;  %s623_s25 = scalar_lea.vmem %s1557_s2, %s1470_s24 }
  0x77   :  { %v617_v16 = vmul.f32 %v616_v11, %v615_v14  ;;  %v638_v17 = vstv %s1472_s1  ;;  %v608_v18 = vadd.f32 %v607_v12, %v598_v13  ;;  %v624_v19 = vld [vmem:[%s623_s25] sm:$0x1]  ;;  %s894_s26 = sld [smem:[#allocation3 + $0x8f]] }
  0x78   :  { %s636_s21 = scalar_lea.vmem %s1557_s2, %s1478_s9  ;;  %v626_v20 = vmul.f32 %v625_v15, %v624_v19  ;;  %s895_s29 = sld [smem:[#allocation4 + $0x10f]]  ;;  %v680_v33 = vstv %s1512_s19 }
  0x79   :  { %v637_v21 = vld [vmem:[%s636_s21] sm:$0x1]  ;;  %v648_v22 = vstv %s1485_s4  ;;  %s896_s27 = sld [smem:[#allocation3 + $0x10f]]  ;;  %v618_v23 = vadd.f32 %v617_v16, %v608_v18 }
  0x7a   :  { %v639_v24 = vmul.f32 %v638_v17, %v637_v21  ;;  %s646_s5 = scalar_lea.vmem %s1557_s2, %s1488_s30  ;;  %s897_s6 = sld [smem:[#allocation4 + $0x18f]]  ;;  %v667_v30 = vstv %s1503_s18 }
  0x7b   :  { %v658_v25 = vstv %s1490_s7  ;;  %v647_v26 = vld [vmem:[%s646_s5] sm:$0x1]  ;;  %s898_s11 = sld [smem:[#allocation3 + $0x18f]]  ;;  %619 = vst.msk [vmem:[%s1558_s3 + $0xd] sm:$0x1] %vm72_vm0, %v618_v23  ;;  %s665_s30 = scalar_lea.vmem %s1557_s2, %s1505_s22 }
  0x7c   :  { %s656_s8 = scalar_lea.vmem %s1557_s2, %s1496_s14  ;;  %v640_v27 = vadd.f32 %v639_v24, %v626_v20  ;;  %v649_v28 = vmul.f32 %v648_v22, %v647_v26  ;;  %v666_v32 = vld [vmem:[%s665_s30] sm:$0x1] }
  0x7d   :  { %v657_v29 = vld [vmem:[%s656_s8] sm:$0x1]  ;;  %v668_v35 = vmul.f32 %v667_v30, %v666_v32  ;;  %s678_s16 = scalar_lea.vmem %s1557_s2, %s894_s26 }
  0x7e   :  { %v659_v31 = vmul.f32 %v658_v25, %v657_v29  ;;  %v650_v34 = vadd.f32 %v649_v28, %v640_v27  ;;  %v679_v36 = vld [vmem:[%s678_s16] sm:$0x1]  ;;  %v690_v37 = vstv %s895_s29 }
  0x7f   :  { %s688_s0 = scalar_lea.vmem %s1557_s2, %s896_s27  ;;  %v681_v39 = vmul.f32 %v680_v33, %v679_v36 }
  0x80   :  { %v660_v38 = vadd.f32 %v659_v31, %v650_v34  ;;  %v689_v40 = vld [vmem:[%s688_s0] sm:$0x1]  ;;  %v700_v41 = vstv %s897_s6 }
  0x81   :  { %v691_v42 = vmul.f32 %v690_v37, %v689_v40  ;;  %s698_s25 = scalar_lea.vmem %s1557_s2, %s898_s11  ;;  %v682_v43 = vadd.f32 %v681_v39, %v668_v35 }
  0x82   :  { %661 = vst.msk [vmem:[%s1558_s3 + $0xe] sm:$0x1] %vm72_vm0, %v660_v38  ;;  %v699_v44 = vld [vmem:[%s698_s25] sm:$0x1] }
  0x83   :  { %v701_v45 = vmul.f32 %v700_v41, %v699_v44  ;;  %v692_v46 = vadd.f32 %v691_v42, %v682_v43 }
  0x85   :  { %v702_v47 = vadd.f32 %v701_v45, %v692_v46 }
  0x87   :  { %703 = vst.msk [vmem:[%s1558_s3 + $0xf] sm:$0x1] %vm72_vm0, %v702_v47 }
  0x88   :  { %708 = vsyncpa [#allocation5], 1 }

</bundles_post_ra>
